<compile_context>
chip_gen: v6e
topology: v6e:2x2x1
jax: 0.10.0
libtpu: 0.0.40
codegen_flags: <defaults>
</compile_context>

<pallas_src>
import jax
import jax.numpy as jnp
from jax.experimental import pallas as pl
from jax.experimental.pallas import tpu as pltpu


NEG_SLOPE = 0.01


def _leaky_relu(h):
    # Valid for 0 < slope < 1: max(h, slope*h) == leaky_relu(h).
    return jnp.maximum(h, NEG_SLOPE * h)


def latent_critic_kernel(x_ref, w1_ref, b1_ref, w2_ref, w3_ref, w4_ref, o_ref):
    """One lane-dense tile of TILE samples.

    x_ref  : (1, TILE)   input samples on the lane axis
    w1_ref : (51, 1)     layer-1 weight column (row 50 == 0)
    b1_ref : (51, 1)     layer-1 bias column   (row 50 == 1)  -> ones row
    w2_ref : (101, 51)   layer-2 weights, b2 folded as column 50,
                         row 100 = e_50 (regenerates the ones row)
    w3_ref : (51, 101)   layer-3 weights, b3 folded as column 100,
                         row 50 = e_100
    w4_ref : (1, 51)     layer-4 weights, b4 folded as column 50
    o_ref  : (1, TILE)
    """
    x = x_ref[...]                                             # (1, TILE)

    # Layer 1 (1 -> 50): K=1, kept on the VPU as a broadcast mul-add.  The
    # augmented 51st row (w=0, b=1) produces the constant-1 row that carries
    # the biases of layers 2/3/4 through the MXU (leaky_relu(1) == 1).
    h = _leaky_relu(w1_ref[...] * x + b1_ref[...])             # (51, TILE)

    # Layer 2 (50 -> 100) + bias in one MXU matmul: (101, 51) @ (51, TILE).
    h = _leaky_relu(
        jnp.dot(w2_ref[...], h, preferred_element_type=jnp.float32))   # (101, TILE)

    # Layer 3 (100 -> 50) + bias: (51, 101) @ (101, TILE).
    h = _leaky_relu(
        jnp.dot(w3_ref[...], h, preferred_element_type=jnp.float32))   # (51, TILE)

    # Layer 4 (50 -> 1) + bias on the MXU: (1, 51) @ (51, TILE).
    out = jnp.dot(w4_ref[...], h, preferred_element_type=jnp.float32)  # (1, TILE)
    o_ref[...] = out.astype(o_ref.dtype)


def _augmented_params(params):
    """Transpose to (out, in) orientation and fold biases via a ones-row."""
    w1, b1, w2, b2, w3, b3, w4, b4 = params
    f32 = jnp.float32

    # Layer 1: 51 rows; row 50 = (weight 0, bias 1) -> constant-1 activation.
    w1a = jnp.concatenate([w1.T, jnp.zeros((1, 1), f32)], axis=0).astype(f32)  # (51, 1)
    b1a = jnp.concatenate([b1.T, jnp.ones((1, 1), f32)], axis=0).astype(f32)   # (51, 1)

    # Layer 2: (101, 51) = [[W2^T | b2^T], [e_50]]
    w2a = jnp.concatenate([w2.T, b2.T], axis=1)                                # (100, 51)
    row2 = jnp.zeros((1, 51), f32).at[0, 50].set(1.0)
    w2a = jnp.concatenate([w2a, row2], axis=0).astype(f32)                     # (101, 51)

    # Layer 3: (51, 101) = [[W3^T | b3^T], [e_100]]
    w3a = jnp.concatenate([w3.T, b3.T], axis=1)                                # (50, 101)
    row3 = jnp.zeros((1, 101), f32).at[0, 100].set(1.0)
    w3a = jnp.concatenate([w3a, row3], axis=0).astype(f32)                     # (51, 101)

    # Layer 4: (1, 51) = [W4^T | b4]
    w4a = jnp.concatenate([w4.T, b4], axis=1).astype(f32)                      # (1, 51)

    return w1a, b1a, w2a, w3a, w4a


def _hw_budget():
    """Per-generation (max_tile, vmem_limit_bytes).

    128-MiB-VMEM parts (v5e / v6e): 64K-lane tiles, ~100 MiB scoped limit.
    64-MiB parts (v7x) or unknown hardware: 32K tiles, conservative 44 MiB
    (peak live f32 intermediates at 32K lanes are ~27 MiB even without buffer
    reuse, leaving headroom for Mosaic internal scratch + I/O double buffers).
    """
    vmem_cap = None
    try:
        info = pltpu.get_tpu_info()
        for name in ("vmem_capacity_bytes", "vmem_size_bytes", "vmem_bytes"):
            v = getattr(info, name, None)
            if v:
                vmem_cap = int(v)
                break
    except Exception:
        vmem_cap = None
    if vmem_cap is not None and vmem_cap >= 96 * 1024 * 1024:
        return 65536, 100 * 1024 * 1024        # v5e / v6e (128 MiB VMEM)
    return 32768, 44 * 1024 * 1024             # v7x (64 MiB VMEM) / unknown


def _choose_tile(n, max_tile):
    """Lane tile: multiple of 128, as large as possible up to max_tile, while
    keeping the grid-step count >= 2 and even (v7x 2-TensorCore balance)."""
    max_tile = max(128, (int(max_tile) // 128) * 128)
    if n <= 128:
        return 128
    tile = min(max_tile, pl.cdiv(n, 128) * 128)
    steps = pl.cdiv(n, tile)
    if steps == 1:
        tile = pl.cdiv(pl.cdiv(n, 2), 128) * 128            # split for megacore
    elif steps % 2 == 1:
        tile = min(tile, pl.cdiv(pl.cdiv(n, steps + 1), 128) * 128)
    return int(max(tile, 128))


def latent_critic_forward(x, params, *, max_tile=None, vmem_limit_bytes=None):
    """x: any-shape array (the module flattens to (-1, 1)). Returns (N, 1) f32."""
    w1a, b1a, w2a, w3a, w4a = _augmented_params(params)

    if max_tile is None or vmem_limit_bytes is None:
        hw_tile, hw_vmem = _hw_budget()
        max_tile = hw_tile if max_tile is None else max_tile
        vmem_limit_bytes = hw_vmem if vmem_limit_bytes is None else vmem_limit_bytes

    xf = x.reshape(-1).astype(jnp.float32)
    n = xf.shape[0]

    tile = _choose_tile(n, max_tile)
    n_pad = pl.cdiv(n, tile) * tile
    if n_pad != n:
        # Only the remainder of the last tile is padded (flat 1-D pad).
        xf = jnp.pad(xf, (0, n_pad - n))
    x_row = xf.reshape(1, n_pad)               # samples on the lane axis

    grid = (n_pad // tile,)
    full = lambda a: pl.BlockSpec(a.shape, lambda i: (0, 0))

    param_bytes = sum(int(p.size) * 4 for p in (w1a, b1a, w2a, w3a, w4a))
    cost = pl.CostEstimate(
        flops=21000 * int(n_pad),
        transcendentals=0,
        bytes_accessed=8 * int(n_pad) + param_bytes,
    )

    out = pl.pallas_call(
        latent_critic_kernel,
        out_shape=jax.ShapeDtypeStruct((1, n_pad), jnp.float32),
        grid_spec=pltpu.PrefetchScalarGridSpec(
            num_scalar_prefetch=0,
            grid=grid,
            in_specs=[
                pl.BlockSpec((1, tile), lambda i: (0, i)),   # lane-dense x tile
                full(w1a), full(b1a), full(w2a), full(w3a), full(w4a),
            ],
            out_specs=pl.BlockSpec((1, tile), lambda i: (0, i)),
        ),
        compiler_params=pltpu.CompilerParams(
            dimension_semantics=("parallel",),
            vmem_limit_bytes=int(vmem_limit_bytes),
        ),
        cost_estimate=cost,
    )(x_row, w1a, b1a, w2a, w3a, w4a)

    result = out.reshape(-1, 1)
    if n_pad != n:
        result = result[:n]
    return result


def init_params(key):
    """Deterministic init mimicking PyTorch nn.Linear default
    (U[-1/sqrt(fan_in), 1/sqrt(fan_in)]).  Stored as (in, out) + (1, out)."""
    dims = [(1, 50), (50, 100), (100, 50), (50, 1)]
    params = []
    for (fan_in, fan_out) in dims:
        key, kw, kb = jax.random.split(key, 3)
        bound = 1.0 / jnp.sqrt(fan_in)
        w = jax.random.uniform(kw, (fan_in, fan_out), jnp.float32, -bound, bound)
        b = jax.random.uniform(kb, (1, fan_out), jnp.float32, -bound, bound)
        params.extend([w, b])
    return tuple(params)


def reference_forward(x, params):
    """Pure-JAX reference of the PyTorch forward, for a sanity check."""
    w1, b1, w2, b2, w3, b3, w4, b4 = params
    h = x.reshape(-1, 1).astype(jnp.float32)
    h = jax.nn.leaky_relu(h @ w1 + b1, NEG_SLOPE)
    h = jax.nn.leaky_relu(h @ w2 + b2, NEG_SLOPE)
    h = jax.nn.leaky_relu(h @ w3 + b3, NEG_SLOPE)
    return h @ w4 + b4


if __name__ == "__main__":
    key = jax.random.PRNGKey(0)
    k_param, k_x = jax.random.split(key)

    params = init_params(k_param)

    # Small NCHW-style input; the module flattens it to (-1, 1) anyway.
    x = jax.random.normal(k_x, (2, 4, 16, 16), dtype=jnp.float32)

    out = latent_critic_forward(x, params)
    out = jax.block_until_ready(out)

    ref = reference_forward(x, params)
    assert out.shape == (x.size, 1), out.shape
    assert jnp.allclose(out, ref, atol=1e-4, rtol=1e-5), "mismatch vs reference"

    print("KERNEL_OK")
</pallas_src>

<mosaic_0001>
module attributes {stable_mosaic.version = 11 : i64} {
  func.func @latent_critic_kernel(%arg0: i32, %arg1: memref<1x1024xf32, #tpu.memory_space<vmem>>, %arg2: memref<51x1xf32, #tpu.memory_space<vmem>>, %arg3: memref<51x1xf32, #tpu.memory_space<vmem>>, %arg4: memref<101x51xf32, #tpu.memory_space<vmem>>, %arg5: memref<51x101xf32, #tpu.memory_space<vmem>>, %arg6: memref<1x51xf32, #tpu.memory_space<vmem>>, %arg7: memref<1x1024xf32, #tpu.memory_space<vmem>>) attributes {dimension_semantics = [#tpu.dimension_semantics<parallel>], iteration_bounds = array<i64: 2>, scalar_prefetch = 0 : i64, scratch_operands = 0 : i64, tpu.core_type = #tpu.core_type<tc>, window_params = [{transform_indices = @transform_0, window_bounds = array<i64: 1, 1024>}, {pipeline_mode = #tpu.pipeline_mode<synchronous>, transform_indices = @transform_1, window_bounds = array<i64: 51, 1>}, {pipeline_mode = #tpu.pipeline_mode<synchronous>, transform_indices = @transform_2, window_bounds = array<i64: 51, 1>}, {pipeline_mode = #tpu.pipeline_mode<synchronous>, transform_indices = @transform_3, window_bounds = array<i64: 101, 51>}, {pipeline_mode = #tpu.pipeline_mode<synchronous>, transform_indices = @transform_4, window_bounds = array<i64: 51, 101>}, {pipeline_mode = #tpu.pipeline_mode<synchronous>, transform_indices = @transform_5, window_bounds = array<i64: 1, 51>}, {transform_indices = @transform_6, window_bounds = array<i64: 1, 1024>}]} {
    %c0 = arith.constant 0 : index
    %c0_0 = arith.constant 0 : index
    %0 = vector.load %arg1[%c0, %c0_0] : memref<1x1024xf32, #tpu.memory_space<vmem>>, vector<1x1024xf32>
    %c0_1 = arith.constant 0 : index
    %c0_2 = arith.constant 0 : index
    %1 = vector.load %arg2[%c0_1, %c0_2] : memref<51x1xf32, #tpu.memory_space<vmem>>, vector<51x1xf32>
    %2 = vector.broadcast %1 : vector<51x1xf32> to vector<51x1024xf32>
    %3 = vector.broadcast %0 : vector<1x1024xf32> to vector<51x1024xf32>
    %4 = arith.mulf %2, %3 : vector<51x1024xf32>
    %c0_3 = arith.constant 0 : index
    %c0_4 = arith.constant 0 : index
    %5 = vector.load %arg3[%c0_3, %c0_4] : memref<51x1xf32, #tpu.memory_space<vmem>>, vector<51x1xf32>
    %6 = vector.broadcast %5 : vector<51x1xf32> to vector<51x1024xf32>
    %7 = arith.addf %4, %6 : vector<51x1024xf32>
    %cst = arith.constant 0.00999999977 : f32
    %8 = vector.broadcast %cst : f32 to vector<51x1024xf32>
    %9 = arith.mulf %8, %7 : vector<51x1024xf32>
    %10 = arith.maximumf %7, %9 : vector<51x1024xf32>
    %c0_5 = arith.constant 0 : index
    %c0_6 = arith.constant 0 : index
    %11 = vector.load %arg4[%c0_5, %c0_6] : memref<101x51xf32, #tpu.memory_space<vmem>>, vector<101x51xf32>
    %cst_7 = arith.constant dense<0.000000e+00> : vector<101x1024xf32>
    %12 = tpu.matmul %11, %10, %cst_7 {dimension_numbers = #tpu.dot_dimension_numbers<[1], [0], [0], [1], [0, 0, 1, 1], [], []>} : vector<101x51xf32>, vector<51x1024xf32>, vector<101x1024xf32> -> vector<101x1024xf32>
    %cst_8 = arith.constant 0.00999999977 : f32
    %13 = vector.broadcast %cst_8 : f32 to vector<101x1024xf32>
    %14 = arith.mulf %13, %12 : vector<101x1024xf32>
    %15 = arith.maximumf %12, %14 : vector<101x1024xf32>
    %c0_9 = arith.constant 0 : index
    %c0_10 = arith.constant 0 : index
    %16 = vector.load %arg5[%c0_9, %c0_10] : memref<51x101xf32, #tpu.memory_space<vmem>>, vector<51x101xf32>
    %cst_11 = arith.constant dense<0.000000e+00> : vector<51x1024xf32>
    %17 = tpu.matmul %16, %15, %cst_11 {dimension_numbers = #tpu.dot_dimension_numbers<[1], [0], [0], [1], [0, 0, 1, 1], [], []>} : vector<51x101xf32>, vector<101x1024xf32>, vector<51x1024xf32> -> vector<51x1024xf32>
    %cst_12 = arith.constant 0.00999999977 : f32
    %18 = vector.broadcast %cst_12 : f32 to vector<51x1024xf32>
    %19 = arith.mulf %18, %17 : vector<51x1024xf32>
    %20 = arith.maximumf %17, %19 : vector<51x1024xf32>
    %c0_13 = arith.constant 0 : index
    %c0_14 = arith.constant 0 : index
    %21 = vector.load %arg6[%c0_13, %c0_14] : memref<1x51xf32, #tpu.memory_space<vmem>>, vector<1x51xf32>
    %cst_15 = arith.constant dense<0.000000e+00> : vector<1x1024xf32>
    %22 = tpu.matmul %21, %20, %cst_15 {dimension_numbers = #tpu.dot_dimension_numbers<[1], [0], [0], [1], [0, 0, 1, 1], [], []>} : vector<1x51xf32>, vector<51x1024xf32>, vector<1x1024xf32> -> vector<1x1024xf32>
    %c0_16 = arith.constant 0 : index
    %c0_17 = arith.constant 0 : index
    %23 = vector.load %arg7[%c0_16, %c0_17] : memref<1x1024xf32, #tpu.memory_space<vmem>>, vector<1x1024xf32>
    tpu.vector_store %arg7[%c0_16, %c0_17], %22 {strides = array<i32>} : memref<1x1024xf32, #tpu.memory_space<vmem>>, vector<1x1024xf32>,
    return
  }
  func.func @transform_0(%arg0: i32) -> (i32, i32) {
    %c0_i32 = arith.constant 0 : i32
    %c0_i32_0 = arith.constant 0 : i32
    return %c0_i32, %arg0 : i32, i32
  }
  func.func @transform_1(%arg0: i32) -> (i32, i32) {
    %c0_i32 = arith.constant 0 : i32
    %c0_i32_0 = arith.constant 0 : i32
    %c0_i32_1 = arith.constant 0 : i32
    return %c0_i32, %c0_i32_0 : i32, i32
  }
  func.func @transform_2(%arg0: i32) -> (i32, i32) {
    %c0_i32 = arith.constant 0 : i32
    %c0_i32_0 = arith.constant 0 : i32
    %c0_i32_1 = arith.constant 0 : i32
    return %c0_i32, %c0_i32_0 : i32, i32
  }
  func.func @transform_3(%arg0: i32) -> (i32, i32) {
    %c0_i32 = arith.constant 0 : i32
    %c0_i32_0 = arith.constant 0 : i32
    %c0_i32_1 = arith.constant 0 : i32
    return %c0_i32, %c0_i32_0 : i32, i32
  }
  func.func @transform_4(%arg0: i32) -> (i32, i32) {
    %c0_i32 = arith.constant 0 : i32
    %c0_i32_0 = arith.constant 0 : i32
    %c0_i32_1 = arith.constant 0 : i32
    return %c0_i32, %c0_i32_0 : i32, i32
  }
  func.func @transform_5(%arg0: i32) -> (i32, i32) {
    %c0_i32 = arith.constant 0 : i32
    %c0_i32_0 = arith.constant 0 : i32
    %c0_i32_1 = arith.constant 0 : i32
    return %c0_i32, %c0_i32_0 : i32, i32
  }
  func.func @transform_6(%arg0: i32) -> (i32, i32) {
    %c0_i32 = arith.constant 0 : i32
    %c0_i32_0 = arith.constant 0 : i32
    return %c0_i32, %arg0 : i32, i32
  }
}

</mosaic_0001>

<bundles_post_ra>
// kernel: tpu_custom_call.1
= control target key start
LH: loop header
LB: loop body
LE: loop exit
PB: predicated region body
PF: predicated region fallthrough
CT: control target
= control target key end

     0   :  { %11 = vsyncpa [#allocation3], 0  ;;  %s3943_s0 = inlined_call_operand.vmem [shape: f32[1,2048], index: 0, kind: input, shape index: {}]   ;;  %s3944_s1 = inlined_call_operand.vmem [shape: f32[51,1], index: 1, kind: input, shape index: {}]   ;;  %s3945_s2 = inlined_call_operand.vmem [shape: f32[51,1], index: 2, kind: input, shape index: {}]   ;;  %s3946_s3 = inlined_call_operand.vmem [shape: f32[101,51], index: 3, kind: input, shape index: {}]   ;;  %s3947_s4 = inlined_call_operand.vmem [shape: f32[51,101], index: 4, kind: input, shape index: {}]   ;;  %s3948_s5 = inlined_call_operand.vmem [shape: f32[1,51], index: 5, kind: input, shape index: {}]   ;;  %s3949_s6 = inlined_call_operand.hbm [shape: f32[1,2048], index: 6, kind: output, shape index: {}]  }
   0x1   :  { %13 = vsyncpa [#allocation3 + $0x1], 0  ;;  %s2759_s21 = smov 0   ;;  %s2761_s22 = smov 0  }
   0x2   :  { %s2763_s23 = smov 0   ;;  %s2765_s24 = smov 0  }
   0x3 LB: > { %s2780_s25 = sadd.s32 4294967295, %s2718_s24   ;;  %s2494_s26 = sadd.s32 4294967294, %s2718_s24   ;;  %s2718_s24 = sphi %s2765_s24, %s4040_s24   ;;  %s2714_s23 = sphi %s2763_s23, %s4039_s23   ;;  %s2710_s22 = sphi %s2761_s22, %s4038_s22   ;;  %s2706_s21 = sphi %s2759_s21, %s4037_s21  }
   0x4   : > { %s2784_s27 = sadd.s32 1, %s2718_s24   ;;  %s157_s28 = sadd.s32 1, %s2714_s23 }
   0x5   : > { %s154_s29 = ssub.s32 %s2718_s24, %s2784_s27  ;;  %p167_p0 = scmp.ne.s32.totalorder %s2714_s23, %s2710_s22 }
   0x6   : > { %p155_p1 = scmp.eq.s32.totalorder %s154_s29, 0  ;;  %p168_p2 = scmp.eq.s32.totalorder %s2780_s25, 1 }
   0x7   : > { %p173_p3 = scmp.ne.s32.totalorder %s2710_s22, %s2706_s21  ;;  %p174_p4 = scmp.eq.s32.totalorder %s2494_s26, 1 }
   0x8   : > { %s2795_s30 = scalar_select %p155_p1, %s2714_s23, %s157_s28  }
   0x9   : > { %p2797_p5 = por %p168_p2, %p167_p0  ;;  %p2801_p6 = por %p174_p4, %p173_p3 }
   0xa   : > { %p2497_p7 = scmp.ge.s32.totalorder %s2718_s24, 1  ;;  %p215_p8 = scmp.lt.s32.totalorder %s2718_s24, 3 }
   0xc   : > { %p216_p9 = pnand %p2497_p7, %p215_p8 }
   0xe   : > { %219 = sbr.rel (%p216_p9) target bundleno = 964 (0x3c4), region = 44 }
  0x13   : > { %v396_v0 = vld [vmem:[%s3945_s2 + $0x30] sm:$0x7]  ;;  %v2720_v2 = vmov 0   ;;  %v256_v3 = vld [vmem:[%s3944_s1 + $0x28] sm:$0xff]  ;;  %v255_v4 = vld [vmem:[%s3944_s1 + $0x20] sm:$0xff]  ;;  %v3950_v15 = vmov 0.0   ;;  %v294_v16 = vlaneseq }
  0x14   : > { %v257_v1 = vld [vmem:[%s3944_s1 + $0x30] sm:$0x7]  ;;  %2657 = vset.pattern.permute.xlu1 %v2720_v2  ;;  %2656 = vset.pattern.permute.xlu0 %v2720_v2  ;;  %v395_v5 = vld [vmem:[%s3945_s2 + $0x28] sm:$0xff]  ;;  %v254_v6 = vld [vmem:[%s3944_s1 + $0x18] sm:$0xff]  ;;  %s2499_s28 = sshll.u32 %s2780_s25, 3  ;;  %vm653_vm0 = vcmask 1042432  }
  0x15   : > { %429 = vperm.xlu1 %2657, %v396_v0   ;;  %290 = vperm.xlu0 %2656, %v257_v1   ;;  %v394_v7 = vld [vmem:[%s3945_s2 + $0x20] sm:$0xff]  ;;  %v253_v8 = vld [vmem:[%s3944_s1 + $0x10] sm:$0xff]  ;;  %v393_v9 = vld [vmem:[%s3945_s2 + $0x18] sm:$0xff]  ;;  %p245_p10 = scmp.lt.s32.totalorder %s2499_s28, 15  ;;  %v2852_v17 = vshrl.u32 %v294_v16, 7  ;;  %vm613_vm1 = vcmask 416768  }
  0x16   : > { %v252_v10 = vld [vmem:[%s3944_s1 + $0x8] sm:$0xff]  ;;  %v392_v11 = vld [vmem:[%s3945_s2 + $0x10] sm:$0xff]  ;;  %v251_v12 = vld [vmem:[%s3944_s1] sm:$0xff]  ;;  %742 = vmatprep.mubr.f32.mxu0 %v3950_v15  ;;  %885 = vmatprep.mubr.f32.mxu1 %v3950_v15  ;;  %vm1487_vm2 = vcmask 1044480   ;;  %vm1465_vm3 = vcmask 826368   ;;  %s241_s29 = sand.u32 1, %s2710_s22  }
  0x17   : > { %v391_v13 = vld [vmem:[%s3945_s2 + $0x8] sm:$0xff]  ;;  %v390_v14 = vld [vmem:[%s3945_s2] sm:$0xff]  ;;  %s4042_s28 = smov (!%p245_p10, %s2499_s28), 15  ;;  %3986 = vst [vmem:[#allocation5_spill] sm:$0xff] %v2852_v17  ;;  %v300_v18 = vsub.s32 1, %v2852_v17  ;;  %v308_v19 = vsub.s32 3, %v2852_v17 }
  0x18   : > { %s247_s10 = scalar_lea.vmem %s3943_s0, %s4042_s28  ;;  %v296_v20 = vsub.s32 0, %v2852_v17  ;;  %v304_v21 = vsub.s32 2, %v2852_v17  ;;  %v316_v23 = vsub.s32 5, %v2852_v17  ;;  %v324_v24 = vsub.s32 7, %v2852_v17  ;;  %s2498_s9 = sshll.u32 %s241_s29, 3 }
  0x19   : > { %285 = vperm.xlu0 %2656, %v256_v3   ;;  %280 = vperm.xlu1 %2657, %v255_v4   ;;  %v250_v22 = vld [vmem:[%s247_s10] sm:$0xff]  ;;  %v312_v25 = vsub.s32 4, %v2852_v17  ;;  %v320_v26 = vsub.s32 6, %v2852_v17  ;;  %s2613_s10 = sshll.u32 %s2780_s25, 7  ;;  %s243_s11 = scalar_lea.vmem [#allocation2], %s2498_s9 }
  0x1a   : > { %v2865_v27 = vrot.slane %v250_v22, %v300_v18  ;;  %v2867_v28 = vrot.slane %v250_v22, %v308_v19  ;;  %v2869_v29 = vrot.slane %v250_v22, %v296_v20  ;;  %v2871_v30 = vrot.slane %v250_v22, %v304_v21  ;;  %s2438_s12 = sshll.u32 %s243_s11, 4  ;;  %s2436_s15 = scalar_lea.hbm %s3949_s6, %s2613_s10  ;;  %s2439_s12 = int_to_ptr.vmem [resolvable:$true] %s2438_s12 }
  0x1b   : > { %v2873_v31 = vrot.slane %v250_v22, %v316_v23  ;;  %v2875_v32 = vrot.slane %v250_v22, %v324_v24  ;;  %v2877_v33 = vrot.slane %v250_v22, %v312_v25  ;;  %v2879_v34 = vrot.slane %v250_v22, %v320_v26  ;;  %s2424_s16 = scalar_lea.sflag [#allocation3], %s241_s29  ;;  %s2658_s17 = scalar_lea.vmem %s2439_s12, 128 }
  0x1c   : > { %p2659_p11 = scmp.ne.s32.totalorder %s2439_s12, %s2658_s17  ;;  %s2723_s18 = smov [#allocation2]  }
  0x1d   : > { %424 = vperm.xlu0 %2656, %v395_v5   ;;  %275 = vperm.xlu1 %2657, %v254_v6   ;;  %s2662_s19 = sshll.u32 %s2723_s18, 4  ;;  %s2663_s19 = int_to_ptr.vmem [resolvable:$false] %s2662_s19 }
  0x1e   : > { %p2660_p12 = pnand %p2659_p11, %p2797_p5  ;;  %s2664_s25 = scalar_lea.vmem %s2663_s19, 256 }
  0x1f   : > { %p2665_p0 = scmp.lt.s32.totalorder %s2439_s12, %s2663_s19  ;;  %p2666_p1 = scmp.lt.s32.totalorder %s2664_s25, %s2658_s17 }
  0x20   : > { %p2661_p13 = pneg %p2660_p12 }
  0x21   : > { %419 = vperm.xlu0 %2656, %v394_v7   ;;  %270 = vperm.xlu1 %2657, %v253_v8   ;;  %p2667_p2 = por %p2666_p1, %p2665_p0 }
  0x23   : > { %p2668_p3 = pnand %p2667_p2, %p2661_p13 }
  0x25   : > { %414 = vperm.xlu0 %2656, %v393_v9   ;;  %265 = vperm.xlu1 %2657, %v252_v10  }
  0x29   : > { %409 = vperm.xlu0 %2656, %v392_v11   ;;  %260 = vperm.xlu1 %2657, %v251_v12  }
  0x2d   : > { %404 = vperm.xlu0 %2656, %v391_v13   ;;  %399 = vperm.xlu1 %2657, %v390_v14  }
  0x90   : > { %v430_v35 = vpop.permute.xlu1 %429  ;;  %v291_v36 = vpop.permute.xlu0 %290 }
  0x91   : > { %v383_v37 = vmul.f32 %v2865_v27, %v291_v36  ;;  %v385_v38 = vmul.f32 %v2867_v28, %v291_v36  ;;  %v382_v39 = vmul.f32 %v2869_v29, %v291_v36  ;;  %v384_v40 = vmul.f32 %v2871_v30, %v291_v36 }
  0x92   : > { %v387_v41 = vmul.f32 %v2873_v31, %v291_v36  ;;  %v389_v42 = vmul.f32 %v2875_v32, %v291_v36  ;;  %v386_v43 = vmul.f32 %v2877_v33, %v291_v36  ;;  %v388_v44 = vmul.f32 %v2879_v34, %v291_v36 }
  0x93   : > { %v481_v45 = vadd.f32 %v430_v35, %v383_v37  ;;  %v483_v46 = vadd.f32 %v430_v35, %v385_v38  ;;  %v480_v47 = vadd.f32 %v430_v35, %v382_v39  ;;  %v482_v48 = vadd.f32 %v430_v35, %v384_v40 }
  0x94   : > { %v2889_v49 = vpop.permute.xlu0 %285  ;;  %v2891_v50 = vpop.permute.xlu1 %280  ;;  %v2893_v51 = vadd.f32 %v430_v35, %v387_v41  ;;  %v2895_v52 = vadd.f32 %v430_v35, %v389_v42  ;;  %v2897_v53 = vadd.f32 %v430_v35, %v386_v43  ;;  %v2899_v54 = vadd.f32 %v430_v35, %v388_v44 }
  0x95   : > { %v537_v55 = vmul.f32 0.01, %v481_v45  ;;  %v539_v56 = vmul.f32 0.01, %v483_v46  ;;  %v536_v57 = vmul.f32 0.01, %v480_v47  ;;  %v375_v58 = vmul.f32 %v2865_v27, %v2889_v49 }
  0x96   : > { %v538_v59 = vmul.f32 0.01, %v482_v48  ;;  %v377_v60 = vmul.f32 %v2867_v28, %v2889_v49  ;;  %v374_v61 = vmul.f32 %v2869_v29, %v2889_v49  ;;  %v376_v62 = vmul.f32 %v2871_v30, %v2889_v49 }
  0x97   : > { %v593_v63 = vmax.f32 %v481_v45, %v537_v55  ;;  %v595_v0 = vmax.f32 %v483_v46, %v539_v56  ;;  %v592_v1 = vmax.f32 %v480_v47, %v536_v57  ;;  %v367_v2 = vmul.f32 %v2865_v27, %v2891_v50 }
  0x98   : > { %v2911_v3 = vpop.permute.xlu0 %424  ;;  %v2913_v4 = vpop.permute.xlu1 %275  ;;  %v594_v5 = vmax.f32 %v482_v48, %v538_v59  ;;  %v369_v6 = vmul.f32 %v2867_v28, %v2891_v50  ;;  %v366_v7 = vmul.f32 %v2869_v29, %v2891_v50  ;;  %v368_v8 = vmul.f32 %v2871_v30, %v2891_v50 }
  0x99   : > { %2500 = vmatprep.subr.msk.mxu0 %vm653_vm0, %v593_v63  ;;  %2515 = vmatprep.subr.msk.mxu1 %vm653_vm0, %v595_v0  ;;  %v473_v9 = vadd.f32 %v2911_v3, %v375_v58  ;;  %v475_v10 = vadd.f32 %v2911_v3, %v377_v60  ;;  %v472_v11 = vadd.f32 %v2911_v3, %v374_v61  ;;  %v2927_v12 = vmul.f32 0.01, %v2893_v51 }
  0x9a   : > { %2501 = vmatpush1.msk.msra.mxu0 %vm653_vm0, %v592_v1  ;;  %2516 = vmatpush1.msk.msra.mxu1 %vm653_vm0, %v594_v5  ;;  %v474_v13 = vadd.f32 %v2911_v3, %v376_v62  ;;  %v359_v14 = vmul.f32 %v2865_v27, %v2913_v4  ;;  %v361_v16 = vmul.f32 %v2867_v28, %v2913_v4  ;;  %v2937_v18 = vmul.f32 0.01, %v2895_v52 }
  0x9b   : > { %v529_v19 = vmul.f32 0.01, %v473_v9  ;;  %v531_v20 = vmul.f32 0.01, %v475_v10  ;;  %v528_v21 = vmul.f32 0.01, %v472_v11  ;;  %v358_v22 = vmul.f32 %v2869_v29, %v2913_v4 }
  0x9c   : > { %v2941_v23 = vpop.permute.xlu0 %419  ;;  %v2943_v24 = vpop.permute.xlu1 %270  ;;  %v530_v25 = vmul.f32 0.01, %v474_v13  ;;  %v360_v26 = vmul.f32 %v2871_v30, %v2913_v4  ;;  %v597_v35 = vmax.f32 %v2893_v51, %v2927_v12  ;;  %v599_v36 = vmax.f32 %v2895_v52, %v2937_v18  ;;  %v3051_v51 = vld [vmem:[%s3946_s3 + $0x8] sm:$0xff] }
  0x9d   : > { %v585_v37 = vmax.f32 %v473_v9, %v529_v19  ;;  %v587_v38 = vmax.f32 %v475_v10, %v531_v20  ;;  %v584_v39 = vmax.f32 %v472_v11, %v528_v21  ;;  %v465_v40 = vadd.f32 %v2941_v23, %v367_v2 }
  0x9e   : > { %v586_v41 = vmax.f32 %v474_v13, %v530_v25  ;;  %v467_v42 = vadd.f32 %v2941_v23, %v369_v6  ;;  %v464_v43 = vadd.f32 %v2941_v23, %v366_v7  ;;  %v466_v44 = vadd.f32 %v2941_v23, %v368_v8 }
  0x9f   : > { %698 = vmatprep.subr.mxu0 %v585_v37  ;;  %841 = vmatprep.subr.mxu1 %v587_v38  ;;  %v521_v45 = vmul.f32 0.01, %v465_v40  ;;  %v351_v46 = vmul.f32 %v2865_v27, %v2943_v24  ;;  %v353_v47 = vmul.f32 %v2867_v28, %v2943_v24  ;;  %v350_v48 = vmul.f32 %v2869_v29, %v2943_v24 }
  0xa0   : > { %v2961_v55 = vpop.permute.xlu0 %414  ;;  %v2963_v56 = vpop.permute.xlu1 %265  ;;  %699 = vmatpush1.msra.mxu0 %v584_v39  ;;  %842 = vmatpush1.msra.mxu1 %v586_v41  ;;  %v523_v57 = vmul.f32 0.01, %v467_v42  ;;  %v520_v58 = vmul.f32 0.01, %v464_v43  ;;  %v522_v59 = vmul.f32 0.01, %v466_v44  ;;  %v352_v60 = vmul.f32 %v2871_v30, %v2943_v24 }
  0xa1   : > { %v577_v61 = vmax.f32 %v465_v40, %v521_v45  ;;  %v457_v62 = vadd.f32 %v2961_v55, %v359_v14  ;;  %v459_v63 = vadd.f32 %v2961_v55, %v361_v16  ;;  %v456_v0 = vadd.f32 %v2961_v55, %v358_v22 }
  0xa2   : > { %v579_v1 = vmax.f32 %v467_v42, %v523_v57  ;;  %v576_v2 = vmax.f32 %v464_v43, %v520_v58  ;;  %v578_v5 = vmax.f32 %v466_v44, %v522_v59  ;;  %v458_v6 = vadd.f32 %v2961_v55, %v360_v26 }
  0xa3   : > { %700 = vmatprep.subr.mxu0 %v577_v61  ;;  %v513_v7 = vmul.f32 0.01, %v457_v62  ;;  %v515_v8 = vmul.f32 0.01, %v459_v63  ;;  %v512_v9 = vmul.f32 0.01, %v456_v0  ;;  %v343_v10 = vmul.f32 %v2865_v27, %v2963_v56 }
  0xa4   : > { %843 = vmatprep.subr.mxu1 %v579_v1  ;;  %v2973_v11 = vpop.permute.xlu0 %409  ;;  %v2975_v13 = vpop.permute.xlu1 %260  ;;  %701 = vmatpush1.msra.mxu0 %v576_v2  ;;  %v514_v14 = vmul.f32 0.01, %v458_v6  ;;  %v345_v16 = vmul.f32 %v2867_v28, %v2963_v56  ;;  %v342_v19 = vmul.f32 %v2869_v29, %v2963_v56  ;;  %v344_v20 = vmul.f32 %v2871_v30, %v2963_v56 }
  0xa5   : > { %844 = vmatpush1.msra.mxu1 %v578_v5  ;;  %v569_v21 = vmax.f32 %v457_v62, %v513_v7  ;;  %v571_v22 = vmax.f32 %v459_v63, %v515_v8  ;;  %v568_v25 = vmax.f32 %v456_v0, %v512_v9  ;;  %v449_v26 = vadd.f32 %v2973_v11, %v351_v46 }
  0xa6   : > { %v570_v37 = vmax.f32 %v458_v6, %v514_v14  ;;  %v451_v38 = vadd.f32 %v2973_v11, %v353_v47  ;;  %v448_v39 = vadd.f32 %v2973_v11, %v350_v48  ;;  %v450_v40 = vadd.f32 %v2973_v11, %v352_v60 }
  0xa7   : > { %702 = vmatprep.subr.mxu0 %v569_v21  ;;  %845 = vmatprep.subr.mxu1 %v571_v22  ;;  %v505_v41 = vmul.f32 0.01, %v449_v26  ;;  %v335_v42 = vmul.f32 %v2865_v27, %v2975_v13  ;;  %v337_v43 = vmul.f32 %v2867_v28, %v2975_v13  ;;  %v334_v44 = vmul.f32 %v2869_v29, %v2975_v13 }
  0xa8   : > { %v2993_v45 = vpop.permute.xlu0 %404  ;;  %v2995_v46 = vpop.permute.xlu1 %399  ;;  %703 = vmatpush1.msra.mxu0 %v568_v25  ;;  %846 = vmatpush1.msra.mxu1 %v570_v37  ;;  %v507_v47 = vmul.f32 0.01, %v451_v38  ;;  %v504_v48 = vmul.f32 0.01, %v448_v39  ;;  %v506_v57 = vmul.f32 0.01, %v450_v40  ;;  %v336_v58 = vmul.f32 %v2871_v30, %v2975_v13 }
  0xa9   : > { %v561_v59 = vmax.f32 %v449_v26, %v505_v41  ;;  %v441_v27 = vadd.f32 %v2993_v45, %v343_v10  ;;  %v443_v28 = vadd.f32 %v2993_v45, %v345_v16  ;;  %v440_v60 = vadd.f32 %v2993_v45, %v342_v19 }
  0xaa   : > { %v563_v29 = vmax.f32 %v451_v38, %v507_v47  ;;  %v560_v61 = vmax.f32 %v448_v39, %v504_v48  ;;  %v562_v62 = vmax.f32 %v450_v40, %v506_v57  ;;  %v442_v63 = vadd.f32 %v2993_v45, %v344_v20 }
  0xab   : > { %704 = vmatprep.subr.mxu0 %v561_v59  ;;  %v497_v0 = vmul.f32 0.01, %v441_v27  ;;  %v499_v1 = vmul.f32 0.01, %v443_v28  ;;  %v496_v2 = vmul.f32 0.01, %v440_v60  ;;  %v433_v5 = vadd.f32 %v2995_v46, %v335_v42 }
  0xac   : > { %847 = vmatprep.subr.mxu1 %v563_v29  ;;  %705 = vmatpush1.msra.mxu0 %v560_v61  ;;  %v498_v30 = vmul.f32 0.01, %v442_v63  ;;  %v435_v6 = vadd.f32 %v2995_v46, %v337_v43  ;;  %v432_v7 = vadd.f32 %v2995_v46, %v334_v44  ;;  %v434_v8 = vadd.f32 %v2995_v46, %v336_v58  ;;  %v3014_v42 = vld [vmem:[%s3946_s3] sm:$0xff] }
  0xad   : > { %848 = vmatpush1.msra.mxu1 %v562_v62  ;;  %v553_v9 = vmax.f32 %v441_v27, %v497_v0  ;;  %v555_v10 = vmax.f32 %v443_v28, %v499_v1  ;;  %v552_v14 = vmax.f32 %v440_v60, %v496_v2  ;;  %v489_v16 = vmul.f32 0.01, %v433_v5 }
  0xae   : > { %v554_v19 = vmax.f32 %v442_v63, %v498_v30  ;;  %v491_v20 = vmul.f32 0.01, %v435_v6  ;;  %v488_v21 = vmul.f32 0.01, %v432_v7  ;;  %v490_v22 = vmul.f32 0.01, %v434_v8 }
  0xaf   : > { %706 = vmatprep.subr.mxu0 %v553_v9  ;;  %849 = vmatprep.subr.mxu1 %v555_v10  ;;  %v545_v25 = vmax.f32 %v433_v5, %v489_v16  ;;  %v540_v26 = vmul.f32 0.01, %v2897_v53  ;;  %v542_v37 = vmul.f32 0.01, %v2899_v54  ;;  %v379_v38 = vmul.f32 %v2873_v31, %v2889_v49 }
  0xb0   : > { %707 = vmatpush1.msra.mxu0 %v552_v14  ;;  %850 = vmatpush1.msra.mxu1 %v554_v19  ;;  %v547_v39 = vmax.f32 %v435_v6, %v491_v20  ;;  %v544_v40 = vmax.f32 %v432_v7, %v488_v21  ;;  %v546_v41 = vmax.f32 %v434_v8, %v490_v22  ;;  %v3077_v19 = vld [vmem:[%s3946_s3 + $0x10] sm:$0xff] }
  0xb1   : > { %708 = vmatprep.subr.mxu0 %v545_v25  ;;  %v596_v43 = vmax.f32 %v2897_v53, %v540_v26  ;;  %v598_v44 = vmax.f32 %v2899_v54, %v542_v37  ;;  %v477_v47 = vadd.f32 %v2911_v3, %v379_v38  ;;  %v381_v48 = vmul.f32 %v2875_v32, %v2889_v49 }
  0xb2   : > { %851 = vmatprep.subr.mxu1 %v547_v39  ;;  %709 = vmatpush1.msra.mxu0 %v544_v40  ;;  %v378_v57 = vmul.f32 %v2877_v33, %v2889_v49  ;;  %v380_v58 = vmul.f32 %v2879_v34, %v2889_v49  ;;  %v371_v59 = vmul.f32 %v2873_v31, %v2891_v50  ;;  %v3094_v40 = vld [vmem:[%s3946_s3 + $0x18] sm:$0xff] }
  0xb3   : > { %852 = vmatpush1.msra.mxu1 %v546_v41  ;;  %2502 = vmatmul.mubr.msk.f32.vlgmr.msra.gmra.mxu0 %vm613_vm1, %v3014_v42  ;;  %v533_v53 = vmul.f32 0.01, %v477_v47  ;;  %v479_v54 = vadd.f32 %v2911_v3, %v381_v48  ;;  %v373_v27 = vmul.f32 %v2875_v32, %v2891_v50  ;;  %v370_v28 = vmul.f32 %v2877_v33, %v2891_v50 }
  0xb4   : > { %2517 = vmatmul.mubr.msk.f32.vlgmr.msra.gmra.mxu1 %vm613_vm1, %v3014_v42  ;;  %2530 = vmatprep.subr.msk.mxu0 %vm653_vm0, %v597_v35  ;;  %v476_v49 = vadd.f32 %v2911_v3, %v378_v57  ;;  %v478_v60 = vadd.f32 %v2911_v3, %v380_v58  ;;  %v469_v29 = vadd.f32 %v2941_v23, %v371_v59 }
  0xb5   : > { %2545 = vmatprep.subr.msk.mxu1 %vm653_vm0, %v599_v36  ;;  %2531 = vmatpush1.msk.msra.mxu0 %vm653_vm0, %v596_v43  ;;  %v589_v61 = vmax.f32 %v477_v47, %v533_v53  ;;  %v535_v62 = vmul.f32 0.01, %v479_v54  ;;  %v471_v12 = vadd.f32 %v2941_v23, %v373_v27  ;;  %v468_v3 = vadd.f32 %v2941_v23, %v370_v28 }
  0xb6   : > { %2546 = vmatpush1.msk.msra.mxu1 %vm653_vm0, %v598_v44  ;;  %748 = vmatprep.mubr.f32.mxu0 %v3950_v15  ;;  %v532_v52 = vmul.f32 0.01, %v476_v49  ;;  %v534_v18 = vmul.f32 0.01, %v478_v60  ;;  %v525_v35 = vmul.f32 0.01, %v469_v29  ;;  %v372_v36 = vmul.f32 %v2879_v34, %v2891_v50 }
  0xb7   : > { %984 = vmatprep.subr.mxu0 %v589_v61  ;;  %v591_v63 = vmax.f32 %v479_v54, %v535_v62  ;;  %891 = vmatprep.mubr.f32.mxu1 %v3950_v15  ;;  %v527_v0 = vmul.f32 0.01, %v471_v12  ;;  %v524_v1 = vmul.f32 0.01, %v468_v3  ;;  %v363_v2 = vmul.f32 %v2873_v31, %v2913_v4 }
  0xb8   : > { %v588_v5 = vmax.f32 %v476_v49, %v532_v52  ;;  %v590_v30 = vmax.f32 %v478_v60, %v534_v18  ;;  %2503 = vmatmul.mubr.msk.f32.gmra.mxu0 %vm613_vm1, %v3051_v51  ;;  %2518 = vmatmul.mubr.msk.f32.gmra.mxu1 %vm613_vm1, %v3051_v51  ;;  %v581_v6 = vmax.f32 %v469_v29, %v525_v35 }
  0xb9   : > { %1127 = vmatprep.subr.mxu1 %v591_v63  ;;  %v583_v50 = vmax.f32 %v471_v12, %v527_v0  ;;  %v580_v7 = vmax.f32 %v468_v3, %v524_v1  ;;  %v470_v8 = vadd.f32 %v2941_v23, %v372_v36  ;;  %v461_v9 = vadd.f32 %v2961_v55, %v363_v2  ;;  %v3119_v12 = vld [vmem:[%s3946_s3 + $0x20] sm:$0xff] }
  0xba   : > { %985 = vmatpush1.msra.mxu0 %v588_v5  ;;  %1128 = vmatpush1.msra.mxu1 %v590_v30  ;;  %v365_v10 = vmul.f32 %v2875_v32, %v2913_v4  ;;  %v362_v14 = vmul.f32 %v2877_v33, %v2913_v4  ;;  %v364_v16 = vmul.f32 %v2879_v34, %v2913_v4 }
  0xbb   : > { %986 = vmatprep.subr.mxu0 %v581_v6  ;;  %1129 = vmatprep.subr.mxu1 %v583_v50  ;;  %v526_v23 = vmul.f32 0.01, %v470_v8  ;;  %v517_v20 = vmul.f32 0.01, %v461_v9  ;;  %v355_v21 = vmul.f32 %v2873_v31, %v2943_v24  ;;  %v357_v22 = vmul.f32 %v2875_v32, %v2943_v24 }
  0xbc   : > { %987 = vmatpush1.msra.mxu0 %v580_v7  ;;  %v463_v25 = vadd.f32 %v2961_v55, %v365_v10  ;;  %754 = vmatprep.mubr.f32.mxu0 %v3950_v15  ;;  %v460_v4 = vadd.f32 %v2961_v55, %v362_v14  ;;  %v462_v26 = vadd.f32 %v2961_v55, %v364_v16  ;;  %v3147_v14 = vld [vmem:[%s3946_s3 + $0x28] sm:$0xff] }
  0xbd   : > { %v582_v37 = vmax.f32 %v470_v8, %v526_v23  ;;  %v573_v38 = vmax.f32 %v461_v9, %v517_v20  ;;  %897 = vmatprep.mubr.f32.mxu1 %v3950_v15  ;;  %2504 = vmatmul.mubr.msk.f32.gmra.mxu0 %vm613_vm1, %v3077_v19  ;;  %v453_v39 = vadd.f32 %v2973_v11, %v355_v21 }
  0xbe   : > { %v519_v41 = vmul.f32 0.01, %v463_v25  ;;  %v516_v43 = vmul.f32 0.01, %v460_v4  ;;  %v518_v44 = vmul.f32 0.01, %v462_v26  ;;  %2519 = vmatmul.mubr.msk.f32.gmra.mxu1 %vm613_vm1, %v3077_v19  ;;  %v455_v55 = vadd.f32 %v2973_v11, %v357_v22  ;;  %760 = vmatprep.mubr.f32.mxu0 %v3950_v15 }
  0xbf   : > { %1130 = vmatpush1.msra.mxu1 %v582_v37  ;;  %988 = vmatprep.subr.mxu0 %v573_v38  ;;  %v509_v47 = vmul.f32 0.01, %v453_v39  ;;  %v354_v48 = vmul.f32 %v2877_v33, %v2943_v24  ;;  %v356_v57 = vmul.f32 %v2879_v34, %v2943_v24  ;;  %v347_v58 = vmul.f32 %v2873_v31, %v2963_v56  ;;  %v608_v37 = vld [vmem:[%s3946_s3 + $0x40] sm:$0xff]  ;;  %v609_v38 = vld [vmem:[%s3946_s3 + $0x48] sm:$0xff] }
  0xc0   : > { %v575_v59 = vmax.f32 %v463_v25, %v519_v41  ;;  %v572_v53 = vmax.f32 %v460_v4, %v516_v43  ;;  %v574_v54 = vmax.f32 %v462_v26, %v518_v44  ;;  %v511_v27 = vmul.f32 0.01, %v455_v55  ;;  %903 = vmatprep.mubr.f32.mxu1 %v3950_v15  ;;  %v3162_v4 = vld [vmem:[%s3946_s3 + $0x30] sm:$0xff]  ;;  %v607_v26 = vld [vmem:[%s3946_s3 + $0x38] sm:$0xff]  ;;  %v612_v43 = vld [vmem:[%s3946_s3 + $0x60] sm:$0x1f] }
  0xc1   : > { %v565_v28 = vmax.f32 %v453_v39, %v509_v47  ;;  %v452_v49 = vadd.f32 %v2973_v11, %v354_v48  ;;  %v454_v60 = vadd.f32 %v2973_v11, %v356_v57  ;;  %v445_v29 = vadd.f32 %v2993_v45, %v347_v58  ;;  %2505 = vmatmul.mubr.msk.f32.gmra.mxu0 %vm613_vm1, %v3094_v40  ;;  %v610_v39 = vld [vmem:[%s3946_s3 + $0x50] sm:$0xff]  ;;  %v611_v41 = vld [vmem:[%s3946_s3 + $0x58] sm:$0xff] }
  0xc2   : > { %1131 = vmatprep.subr.mxu1 %v575_v59  ;;  %989 = vmatpush1.msra.mxu0 %v572_v53  ;;  %v567_v24 = vmax.f32 %v455_v55, %v511_v27  ;;  %v349_v61 = vmul.f32 %v2875_v32, %v2963_v56  ;;  %v346_v62 = vmul.f32 %v2877_v33, %v2963_v56 }
  0xc3   : > { %1132 = vmatpush1.msra.mxu1 %v574_v54  ;;  %990 = vmatprep.subr.mxu0 %v565_v28  ;;  %v508_v11 = vmul.f32 0.01, %v452_v49  ;;  %v510_v3 = vmul.f32 0.01, %v454_v60  ;;  %v501_v52 = vmul.f32 0.01, %v445_v29  ;;  %v348_v18 = vmul.f32 %v2879_v34, %v2963_v56 }
  0xc4   : > { %1133 = vmatprep.subr.mxu1 %v567_v24  ;;  %v447_v35 = vadd.f32 %v2993_v45, %v349_v61  ;;  %v444_v36 = vadd.f32 %v2993_v45, %v346_v62  ;;  %2520 = vmatmul.mubr.msk.f32.gmra.mxu1 %vm613_vm1, %v3094_v40  ;;  %v339_v63 = vmul.f32 %v2873_v31, %v2975_v13 }
  0xc5   : > { %v564_v0 = vmax.f32 %v452_v49, %v508_v11  ;;  %v566_v1 = vmax.f32 %v454_v60, %v510_v3  ;;  %v557_v2 = vmax.f32 %v445_v29, %v501_v52  ;;  %v446_v5 = vadd.f32 %v2993_v45, %v348_v18  ;;  %766 = vmatprep.mubr.f32.mxu0 %v3950_v15 }
  0xc6   : > { %v503_v30 = vmul.f32 0.01, %v447_v35  ;;  %v500_v56 = vmul.f32 0.01, %v444_v36  ;;  %v437_v6 = vadd.f32 %v2995_v46, %v339_v63  ;;  %v341_v50 = vmul.f32 %v2875_v32, %v2975_v13  ;;  %909 = vmatprep.mubr.f32.mxu1 %v3950_v15  ;;  %2506 = vmatmul.mubr.msk.f32.gmra.mxu0 %vm613_vm1, %v3119_v12 }
  0xc7   : > { %991 = vmatpush1.msra.mxu0 %v564_v0  ;;  %1134 = vmatpush1.msra.mxu1 %v566_v1  ;;  %v502_v31 = vmul.f32 0.01, %v446_v5  ;;  %v338_v45 = vmul.f32 %v2877_v33, %v2975_v13  ;;  %v340_v7 = vmul.f32 %v2879_v34, %v2975_v13 }
  0xc8   : > { %992 = vmatprep.subr.mxu0 %v557_v2  ;;  %v559_v8 = vmax.f32 %v447_v35, %v503_v30  ;;  %v556_v9 = vmax.f32 %v444_v36, %v500_v56  ;;  %v493_v10 = vmul.f32 0.01, %v437_v6  ;;  %v439_v32 = vadd.f32 %v2995_v46, %v341_v50  ;;  %2521 = vmatmul.mubr.msk.f32.gmra.mxu1 %vm613_vm1, %v3119_v12 }
  0xc9   : > { %v558_v16 = vmax.f32 %v446_v5, %v502_v31  ;;  %v436_v33 = vadd.f32 %v2995_v46, %v338_v45  ;;  %v438_v23 = vadd.f32 %v2995_v46, %v340_v7  ;;  %772 = vmatprep.mubr.f32.mxu0 %v3950_v15  ;;  %915 = vmatprep.mubr.f32.mxu1 %v3950_v15 }
  0xca   : > { %1135 = vmatprep.subr.mxu1 %v559_v8  ;;  %993 = vmatpush1.msra.mxu0 %v556_v9  ;;  %v549_v34 = vmax.f32 %v437_v6, %v493_v10  ;;  %v495_v13 = vmul.f32 0.01, %v439_v32 }
  0xcb   : > { %1136 = vmatpush1.msra.mxu1 %v558_v16  ;;  %v492_v20 = vmul.f32 0.01, %v436_v33  ;;  %v494_v21 = vmul.f32 0.01, %v438_v23  ;;  %2507 = vmatmul.mubr.msk.f32.gmra.mxu0 %vm613_vm1, %v3147_v14 }
  0xcc   : > { %994 = vmatprep.subr.mxu0 %v549_v34  ;;  %v551_v22 = vmax.f32 %v439_v32, %v495_v13  ;;  %2522 = vmatmul.mubr.msk.f32.gmra.mxu1 %vm613_vm1, %v3147_v14 }
  0xcd   : > { %v548_v46 = vmax.f32 %v436_v33, %v492_v20  ;;  %v550_v25 = vmax.f32 %v438_v23, %v494_v21  ;;  %778 = vmatprep.mubr.f32.mxu0 %v3950_v15  ;;  %921 = vmatprep.mubr.f32.mxu1 %v3950_v15 }
  0xce   : > { %1137 = vmatprep.subr.mxu1 %v551_v22 }
  0xcf   : > { %995 = vmatpush1.msra.mxu0 %v548_v46  ;;  %1138 = vmatpush1.msra.mxu1 %v550_v25 }
  0xd0   : > { %2508 = vmatmul.mubr.msk.f32.gmra.mxu0 %vm613_vm1, %v3162_v4  ;;  %2523 = vmatmul.mubr.msk.f32.gmra.mxu1 %vm613_vm1, %v3162_v4 }
  0xd1   : > { %784 = vmatprep.mubr.f32.mxu0 %v3950_v15  ;;  %927 = vmatprep.mubr.f32.mxu1 %v3950_v15 }
  0xd4   : > { %2509 = vmatmul.mubr.msk.f32.gmra.mxu0 %vm613_vm1, %v607_v26  ;;  %2524 = vmatmul.mubr.msk.f32.gmra.mxu1 %vm613_vm1, %v607_v26 }
  0xd5   : > { %790 = vmatprep.mubr.f32.mxu0 %v3950_v15  ;;  %933 = vmatprep.mubr.f32.mxu1 %v3950_v15 }
  0xd8   : > { %2510 = vmatmul.mubr.msk.f32.gmra.mxu0 %vm613_vm1, %v608_v37  ;;  %2525 = vmatmul.mubr.msk.f32.gmra.mxu1 %vm613_vm1, %v608_v37 }
  0xd9   : > { %796 = vmatprep.mubr.f32.mxu0 %v3950_v15  ;;  %939 = vmatprep.mubr.f32.mxu1 %v3950_v15 }
  0xdc   : > { %2511 = vmatmul.mubr.msk.f32.gmra.mxu0 %vm613_vm1, %v609_v38  ;;  %2526 = vmatmul.mubr.msk.f32.gmra.mxu1 %vm613_vm1, %v609_v38 }
  0xdd   : > { %802 = vmatprep.mubr.f32.mxu0 %v3950_v15  ;;  %945 = vmatprep.mubr.f32.mxu1 %v3950_v15 }
  0xe0   : > { %2512 = vmatmul.mubr.msk.f32.gmra.mxu0 %vm613_vm1, %v610_v39  ;;  %2527 = vmatmul.mubr.msk.f32.gmra.mxu1 %vm613_vm1, %v610_v39 }
  0xe1   : > { %808 = vmatprep.mubr.f32.mxu0 %v3950_v15  ;;  %951 = vmatprep.mubr.f32.mxu1 %v3950_v15 }
  0xe4   : > { %2513 = vmatmul.mubr.msk.f32.gmra.mxu0 %vm613_vm1, %v611_v41  ;;  %2528 = vmatmul.mubr.msk.f32.gmra.mxu1 %vm613_vm1, %v611_v41 }
  0xe5   : > { %814 = vmatprep.mubr.f32.mxu0 %v3950_v15  ;;  %957 = vmatprep.mubr.f32.mxu1 %v3950_v15 }
  0xe8   : > { %2514 = vmatmul.mubr.msk.f32.gmra.mxu0 %vm613_vm1, %v612_v43  ;;  %2529 = vmatmul.mubr.msk.f32.gmra.mxu1 %vm613_vm1, %v612_v43 }
  0xe9   : > { %1028 = vmatprep.mubr.f32.mxu0 %v3950_v15  ;;  %1171 = vmatprep.mubr.f32.mxu1 %v3950_v15 }
  0xec   : > { %2532 = vmatmul.mubr.msk.f32.vlgmr.msra.gmra.mxu0 %vm613_vm1, %v3014_v42  ;;  %2547 = vmatmul.mubr.msk.f32.vlgmr.msra.gmra.mxu1 %vm613_vm1, %v3014_v42 }
  0xed   : > { %1034 = vmatprep.mubr.f32.mxu0 %v3950_v15  ;;  %1177 = vmatprep.mubr.f32.mxu1 %v3950_v15 }
  0xf0   : > { %2533 = vmatmul.mubr.msk.f32.gmra.mxu0 %vm613_vm1, %v3051_v51  ;;  %2548 = vmatmul.mubr.msk.f32.gmra.mxu1 %vm613_vm1, %v3051_v51 }
  0xf1   : > { %1040 = vmatprep.mubr.f32.mxu0 %v3950_v15  ;;  %1183 = vmatprep.mubr.f32.mxu1 %v3950_v15 }
  0xf4   : > { %2534 = vmatmul.mubr.msk.f32.gmra.mxu0 %vm613_vm1, %v3077_v19  ;;  %2549 = vmatmul.mubr.msk.f32.gmra.mxu1 %vm613_vm1, %v3077_v19 }
  0xf5   : > { %1046 = vmatprep.mubr.f32.mxu0 %v3950_v15  ;;  %1189 = vmatprep.mubr.f32.mxu1 %v3950_v15 }
  0xf8   : > { %2535 = vmatmul.mubr.msk.f32.gmra.mxu0 %vm613_vm1, %v3094_v40  ;;  %2550 = vmatmul.mubr.msk.f32.gmra.mxu1 %vm613_vm1, %v3094_v40 }
  0xf9   : > { %1052 = vmatprep.mubr.f32.mxu0 %v3950_v15  ;;  %1195 = vmatprep.mubr.f32.mxu1 %v3950_v15 }
  0xfc   : > { %2536 = vmatmul.mubr.msk.f32.gmra.mxu0 %vm613_vm1, %v3119_v12  ;;  %2551 = vmatmul.mubr.msk.f32.gmra.mxu1 %vm613_vm1, %v3119_v12 }
  0xfd   : > { %1058 = vmatprep.mubr.f32.mxu0 %v3950_v15  ;;  %1201 = vmatprep.mubr.f32.mxu1 %v3950_v15 }
 0x100   : > { %2537 = vmatmul.mubr.msk.f32.gmra.mxu0 %vm613_vm1, %v3147_v14  ;;  %2552 = vmatmul.mubr.msk.f32.gmra.mxu1 %vm613_vm1, %v3147_v14 }
 0x101   : > { %1064 = vmatprep.mubr.f32.mxu0 %v3950_v15  ;;  %1207 = vmatprep.mubr.f32.mxu1 %v3950_v15 }
 0x104   : > { %2538 = vmatmul.mubr.msk.f32.gmra.mxu0 %vm613_vm1, %v3162_v4  ;;  %2553 = vmatmul.mubr.msk.f32.gmra.mxu1 %vm613_vm1, %v3162_v4 }
 0x105   : > { %1070 = vmatprep.mubr.f32.mxu0 %v3950_v15  ;;  %1213 = vmatprep.mubr.f32.mxu1 %v3950_v15 }
 0x108   : > { %2539 = vmatmul.mubr.msk.f32.gmra.mxu0 %vm613_vm1, %v607_v26  ;;  %2554 = vmatmul.mubr.msk.f32.gmra.mxu1 %vm613_vm1, %v607_v26 }
 0x109   : > { %1076 = vmatprep.mubr.f32.mxu0 %v3950_v15  ;;  %1219 = vmatprep.mubr.f32.mxu1 %v3950_v15 }
 0x10c   : > { %2540 = vmatmul.mubr.msk.f32.gmra.mxu0 %vm613_vm1, %v608_v37  ;;  %2555 = vmatmul.mubr.msk.f32.gmra.mxu1 %vm613_vm1, %v608_v37 }
 0x10d   : > { %1082 = vmatprep.mubr.f32.mxu0 %v3950_v15  ;;  %1225 = vmatprep.mubr.f32.mxu1 %v3950_v15 }
 0x110   : > { %2541 = vmatmul.mubr.msk.f32.gmra.mxu0 %vm613_vm1, %v609_v38  ;;  %2556 = vmatmul.mubr.msk.f32.gmra.mxu1 %vm613_vm1, %v609_v38 }
 0x111   : > { %1088 = vmatprep.mubr.f32.mxu0 %v3950_v15  ;;  %1231 = vmatprep.mubr.f32.mxu1 %v3950_v15 }
 0x114   : > { %2542 = vmatmul.mubr.msk.f32.gmra.mxu0 %vm613_vm1, %v610_v39  ;;  %2557 = vmatmul.mubr.msk.f32.gmra.mxu1 %vm613_vm1, %v610_v39 }
 0x115   : > { %1094 = vmatprep.mubr.f32.mxu0 %v3950_v15  ;;  %1237 = vmatprep.mubr.f32.mxu1 %v3950_v15 }
 0x118   : > { %2543 = vmatmul.mubr.msk.f32.gmra.mxu0 %vm613_vm1, %v611_v41  ;;  %2558 = vmatmul.mubr.msk.f32.gmra.mxu1 %vm613_vm1, %v611_v41 }
 0x119   : > { %1100 = vmatprep.mubr.f32.mxu0 %v3950_v15  ;;  %1243 = vmatprep.mubr.f32.mxu1 %v3950_v15 }
 0x11c   : > { %2544 = vmatmul.mubr.msk.f32.gmra.mxu0 %vm613_vm1, %v612_v43  ;;  %2559 = vmatmul.mubr.msk.f32.gmra.mxu1 %vm613_vm1, %v612_v43 }
 0x11d   : > { %1576 = vmatprep.mubr.f32.mxu0 %v3950_v15  ;;  %1683 = vmatprep.mubr.f32.mxu1 %v3950_v15 }
 0x173   : > { %v3278_v42 = vpop.f32.mrf.mxu0 }
 0x174   : > { %3987 = vst [vmem:[#allocation6_spill] sm:$0xff] %v3278_v42  ;;  %v3280_v51 = vpop.f32.mrf.mxu1 }
 0x175   : > { %3988 = vst [vmem:[#allocation7_spill] sm:$0xff] %v3280_v51  ;;  %v3282_v19 = vpop.f32.mrf.mxu0 }
 0x176   : > { %3989 = vst [vmem:[#allocation8_spill] sm:$0xff] %v3282_v19  ;;  %v3284_v40 = vpop.f32.mrf.mxu1 }
 0x177   : > { %3990 = vst [vmem:[#allocation9_spill] sm:$0xff] %v3284_v40 }
 0x178   : > { %v3286_v44 = vpop.f32.mrf.mxu0  ;;  %v3288_v55 = vpop.f32.mrf.mxu1 }
 0x179   : > { %3991 = vst [vmem:[#allocation10_spill] sm:$0xff] %v3286_v44  ;;  %3992 = vst [vmem:[#allocation11_spill] sm:$0xff] %v3288_v55 }
 0x17a   : > { %v3290_v47 = vpop.f32.mrf.mxu0  ;;  %v3292_v48 = vpop.f32.mrf.mxu1 }
 0x17b   : > { %3993 = vst [vmem:[#allocation12_spill] sm:$0xff] %v3290_v47  ;;  %3994 = vst [vmem:[#allocation13_spill] sm:$0xff] %v3292_v48 }
 0x17d   : > { %v3294_v57 = vpop.f32.mrf.mxu0 }
 0x17e   : > { %3995 = vst [vmem:[#allocation14_spill] sm:$0xff] %v3294_v57  ;;  %v3296_v58 = vpop.f32.mrf.mxu1 }
 0x17f   : > { %3996 = vst [vmem:[#allocation15_spill] sm:$0xff] %v3296_v58  ;;  %v3298_v59 = vpop.f32.mrf.mxu0 }
 0x180   : > { %v3300_v53 = vpop.f32.mrf.mxu1 }
 0x181   : > { %v3302_v54 = vpop.f32.mrf.mxu0 }
 0x183   : > { %v3304_v27 = vpop.f32.mrf.mxu0 }
 0x184   : > { %v3306_v28 = vpop.f32.mrf.mxu1 }
 0x186   : > { %v3308_v49 = vpop.f32.mrf.mxu1  ;;  %v3310_v60 = vpop.f32.mrf.mxu0 }
 0x188   : > { %v3312_v29 = vpop.f32.mrf.mxu1  ;;  %v3314_v24 = vpop.f32.mrf.mxu0 }
 0x18a   : > { %v3316_v61 = vpop.f32.mrf.mxu1 }
 0x18b   : > { %v3318_v62 = vpop.f32.mrf.mxu0 }
 0x18c   : > { %v3320_v12 = vpop.f32.mrf.mxu1 }
 0x18d   : > { %v3322_v11 = vpop.f32.mrf.mxu0 }
 0x18e   : > { %v3324_v3 = vpop.f32.mrf.mxu1 }
 0x190   : > { %v3326_v52 = vpop.f32.mrf.mxu0  ;;  %v3328_v18 = vpop.f32.mrf.mxu1 }
 0x192   : > { %v3330_v35 = vpop.f32.mrf.mxu0  ;;  %v3332_v36 = vpop.f32.mrf.mxu1 }
 0x194   : > { %v3334_v63 = vpop.f32.mrf.mxu0  ;;  %v3336_v0 = vpop.f32.mrf.mxu1 }
 0x196   : > { %v3338_v1 = vpop.f32.mrf.mxu0  ;;  %v3340_v2 = vpop.f32.mrf.mxu1 }
 0x198   : > { %v3342_v5 = vpop.f32.mrf.mxu0  ;;  %v3344_v30 = vpop.f32.mrf.mxu1 }
 0x19a   : > { %v3346_v56 = vpop.f32.mrf.mxu0  ;;  %v3348_v6 = vpop.f32.mrf.mxu1 }
 0x19c   : > { %v3350_v50 = vpop.f32.mrf.mxu0  ;;  %v3352_v31 = vpop.f32.mrf.mxu1 }
 0x19e   : > { %v3354_v45 = vpop.f32.mrf.mxu0  ;;  %v3356_v7 = vpop.f32.mrf.mxu1 }
 0x1a0   : > { %v3358_v8 = vpop.f32.mrf.mxu0  ;;  %v3360_v9 = vpop.f32.mrf.mxu1 }
 0x1a1   : > { %v1330_v40 = vmul.f32 0.01, %v3358_v8  ;;  %v1332_v19 = vmul.f32 0.01, %v3360_v9 }
 0x1a2   : > { %v3362_v10 = vpop.f32.mrf.mxu0  ;;  %v3364_v32 = vpop.f32.mrf.mxu1 }
 0x1a3   : > { %v1331_v15 = vmul.f32 0.01, %v3362_v10  ;;  %v1333_v17 = vmul.f32 0.01, %v3364_v32 }
 0x1a4   : > { %v810_v14 = vpop.f32.mrf.mxu0  ;;  %v953_v16 = vpop.f32.mrf.mxu1 }
 0x1a5   : > { %v1338_v38 = vmul.f32 0.01, %v810_v14  ;;  %v1340_v39 = vmul.f32 0.01, %v953_v16 }
 0x1a6   : > { %v812_v33 = vpop.f32.mrf.mxu0  ;;  %v955_v23 = vpop.f32.mrf.mxu1 }
 0x1a7   : > { %v1339_v20 = vmul.f32 0.01, %v812_v33  ;;  %v1341_v4 = vmul.f32 0.01, %v955_v23 }
 0x1a8   : > { %v816_v34 = vpop.f32.mrf.mxu0  ;;  %v959_v13 = vpop.f32.mrf.mxu1 }
 0x1a9   : > { %v1346_v21 = vmul.f32 0.01, %v816_v34  ;;  %v1348_v22 = vmul.f32 0.01, %v959_v13  ;;  %v1443_v58 = vmax.f32 %v812_v33, %v1339_v20  ;;  %v1445_v57 = vmax.f32 %v955_v23, %v1341_v4 }
 0x1aa   : > { %v818_v46 = vpop.f32.mrf.mxu0  ;;  %v961_v25 = vpop.f32.mrf.mxu1  ;;  %v1315_v33 = vmul.f32 0.01, %v3346_v56  ;;  %v1437_v23 = vmax.f32 %v3364_v32, %v1333_v17  ;;  %v1434_v20 = vmax.f32 %v3358_v8, %v1330_v40  ;;  %v1309_v17 = vmul.f32 0.01, %v3340_v2 }
 0x1ab   : > { %v1347_v26 = vmul.f32 0.01, %v818_v46  ;;  %v1349_v37 = vmul.f32 0.01, %v961_v25  ;;  %v1450_v55 = vmax.f32 %v816_v34, %v1346_v21  ;;  %v1452_v44 = vmax.f32 %v959_v13, %v1348_v22 }
 0x1ac   : > { %v3366_v41 = vpop.f32.mrf.mxu0  ;;  %v3368_v43 = vpop.f32.mrf.mxu1  ;;  %v1442_v34 = vmax.f32 %v810_v14, %v1338_v38  ;;  %v1444_v13 = vmax.f32 %v953_v16, %v1340_v39  ;;  %v1314_v14 = vmul.f32 0.01, %v3342_v5  ;;  %v1316_v16 = vmul.f32 0.01, %v3344_v30 }
 0x1ad   : > { %3997 = vst [vmem:[#allocation16_spill] sm:$0xff] %v3366_v41  ;;  %3998 = vst [vmem:[#allocation17_spill] sm:$0xff] %v3368_v43  ;;  %v1451_v51 = vmax.f32 %v818_v46, %v1347_v26  ;;  %v1453_v42 = vmax.f32 %v961_v25, %v1349_v37  ;;  %v1323_v41 = vmul.f32 0.01, %v3354_v45  ;;  %v1325_v43 = vmul.f32 0.01, %v3356_v7 }
 0x1ae   : > { %v3374_v48 = vpop.f32.mrf.mxu0  ;;  %v3376_v47 = vpop.f32.mrf.mxu1  ;;  %v1322_v46 = vmul.f32 0.01, %v3350_v50  ;;  %v1324_v25 = vmul.f32 0.01, %v3352_v31  ;;  %v1306_v40 = vmul.f32 0.01, %v3334_v63  ;;  %v1419_v26 = vmax.f32 %v3346_v56, %v1315_v33 }
 0x1af   : > { %3999 = vst [vmem:[#allocation18_spill] sm:$0xff] %v3374_v48  ;;  %4000 = vst [vmem:[#allocation19_spill] sm:$0xff] %v3376_v47  ;;  %2560 = vmatprep.subr.msk.mxu0 %vm1487_vm2, %v1451_v51  ;;  %2569 = vmatprep.subr.msk.mxu1 %vm1487_vm2, %v1453_v42  ;;  %v1317_v51 = vmul.f32 0.01, %v3348_v6  ;;  %v1435_v42 = vmax.f32 %v3362_v10, %v1331_v15  ;;  %v1307_v15 = vmul.f32 0.01, %v3338_v1 }
 0x1b0   : > { %v3384_v21 = vpop.f32.mrf.mxu0  ;;  %v3386_v22 = vpop.f32.mrf.mxu1  ;;  %2561 = vmatpush1.msk.msra.mxu0 %vm1487_vm2, %v1450_v55  ;;  %2570 = vmatpush1.msk.msra.mxu1 %vm1487_vm2, %v1452_v44  ;;  %v1436_v55 = vmax.f32 %v3360_v9, %v1332_v19  ;;  %v1308_v19 = vmul.f32 0.01, %v3336_v0  ;;  %v1426_v8 = vmax.f32 %v3350_v50, %v1322_v46  ;;  %v1428_v9 = vmax.f32 %v3352_v31, %v1324_v25 }
 0x1b1   : > { %4001 = vst [vmem:[#allocation20_spill] sm:$0xff] %v3384_v21  ;;  %4002 = vst [vmem:[#allocation21_spill] sm:$0xff] %v3386_v22  ;;  %1520 = vmatprep.subr.mxu0 %v1443_v58  ;;  %1627 = vmatprep.subr.mxu1 %v1445_v57  ;;  %v1427_v57 = vmax.f32 %v3354_v45, %v1323_v41  ;;  %v1429_v58 = vmax.f32 %v3356_v7, %v1325_v43  ;;  %v1299_v45 = vmul.f32 0.01, %v3330_v35 }
 0x1b2   : > { %v3398_v4 = vpop.f32.mrf.mxu0  ;;  %v3400_v44 = vpop.f32.mrf.mxu1  ;;  %1521 = vmatpush1.msra.mxu0 %v1442_v34  ;;  %1628 = vmatpush1.msra.mxu1 %v1444_v13  ;;  %v1301_v7 = vmul.f32 0.01, %v3332_v36  ;;  %v1421_v37 = vmax.f32 %v3348_v6, %v1317_v51  ;;  %v1298_v50 = vmul.f32 0.01, %v3326_v52  ;;  %v1300_v31 = vmul.f32 0.01, %v3328_v18 }
 0x1b3   : > { %4003 = vst [vmem:[#allocation22_spill] sm:$0xff] %v3400_v44  ;;  %1522 = vmatprep.subr.mxu0 %v1435_v42  ;;  %1629 = vmatprep.subr.mxu1 %v1437_v23  ;;  %v1418_v38 = vmax.f32 %v3342_v5, %v1314_v14  ;;  %v1420_v39 = vmax.f32 %v3344_v30, %v1316_v16  ;;  %v1291_v56 = vmul.f32 0.01, %v3322_v11  ;;  %v1293_v6 = vmul.f32 0.01, %v3324_v3 }
 0x1b4   : > { %v3410_v10 = vpop.f32.mrf.mxu0  ;;  %v3412_v32 = vpop.f32.mrf.mxu1  ;;  %1523 = vmatpush1.msra.mxu0 %v1434_v20  ;;  %1630 = vmatpush1.msra.mxu1 %v1436_v55  ;;  %v1411_v46 = vmax.f32 %v3338_v1, %v1307_v15  ;;  %v1413_v25 = vmax.f32 %v3340_v2, %v1309_v17  ;;  %v1290_v5 = vmul.f32 0.01, %v3318_v62  ;;  %v1292_v30 = vmul.f32 0.01, %v3320_v12 }
 0x1b5   : > { %1524 = vmatprep.subr.mxu0 %v1427_v57  ;;  %1631 = vmatprep.subr.mxu1 %v1429_v58  ;;  %v1410_v34 = vmax.f32 %v3334_v63, %v1306_v40  ;;  %v1412_v13 = vmax.f32 %v3336_v0, %v1308_v19  ;;  %v1283_v1 = vmul.f32 0.01, %v3314_v24  ;;  %v1285_v2 = vmul.f32 0.01, %v3316_v61 }
 0x1b6   : > { %v3422_v41 = vpop.f32.mrf.mxu0  ;;  %v3424_v43 = vpop.f32.mrf.mxu1  ;;  %1525 = vmatpush1.msra.mxu0 %v1426_v8  ;;  %1632 = vmatpush1.msra.mxu1 %v1428_v9  ;;  %v1403_v42 = vmax.f32 %v3330_v35, %v1299_v45  ;;  %v1405_v23 = vmax.f32 %v3332_v36, %v1301_v7  ;;  %v1282_v63 = vmul.f32 0.01, %v3310_v60  ;;  %v1284_v0 = vmul.f32 0.01, %v3312_v29  ;;  %v4004_v45 = vld [vmem:[#allocation14_spill] sm:$0xff]  ;;  %v4005_v7 = vld [vmem:[#allocation15_spill] sm:$0xff] }
 0x1b7   : > { %1526 = vmatprep.subr.mxu0 %v1419_v26  ;;  %1633 = vmatprep.subr.mxu1 %v1421_v37  ;;  %v1402_v14 = vmax.f32 %v3326_v52, %v1298_v50  ;;  %v1404_v16 = vmax.f32 %v3328_v18, %v1300_v31  ;;  %v1275_v35 = vmul.f32 0.01, %v3304_v27  ;;  %v1277_v36 = vmul.f32 0.01, %v3308_v49 }
 0x1b8   : > { %v3434_v33 = vpop.f32.mrf.mxu0  ;;  %v3436_v51 = vpop.f32.mrf.mxu1  ;;  %1527 = vmatpush1.msra.mxu0 %v1418_v38  ;;  %1634 = vmatpush1.msra.mxu1 %v1420_v39  ;;  %v1395_v15 = vmax.f32 %v3322_v11, %v1291_v56  ;;  %v1397_v17 = vmax.f32 %v3324_v3, %v1293_v6  ;;  %v1274_v52 = vmul.f32 0.01, %v3302_v54  ;;  %v1276_v18 = vmul.f32 0.01, %v3306_v28  ;;  %v4006_v38 = vld [vmem:[#allocation12_spill] sm:$0xff]  ;;  %v4007_v39 = vld [vmem:[#allocation13_spill] sm:$0xff] }
 0x1b9   : > { %1528 = vmatprep.subr.mxu0 %v1411_v46  ;;  %1635 = vmatprep.subr.mxu1 %v1413_v25  ;;  %v1394_v57 = vmax.f32 %v3318_v62, %v1290_v5  ;;  %v1396_v58 = vmax.f32 %v3320_v12, %v1292_v30  ;;  %v1267_v11 = vmul.f32 0.01, %v3298_v59  ;;  %v1269_v3 = vmul.f32 0.01, %v3300_v53  ;;  %v4008_v46 = vld [vmem:[#allocation10_spill] sm:$0xff]  ;;  %v4009_v25 = vld [vmem:[#allocation11_spill] sm:$0xff] }
 0x1ba   : > { %v3446_v20 = vpop.f32.mrf.mxu0  ;;  %v3448_v55 = vpop.f32.mrf.mxu1  ;;  %1529 = vmatpush1.msra.mxu0 %v1410_v34  ;;  %1636 = vmatpush1.msra.mxu1 %v1412_v13  ;;  %v1387_v8 = vmax.f32 %v3314_v24, %v1283_v1  ;;  %v1389_v9 = vmax.f32 %v3316_v61, %v1285_v2  ;;  %v1266_v62 = vmul.f32 0.01, %v4004_v45  ;;  %v1268_v12 = vmul.f32 0.01, %v4005_v7  ;;  %v4010_v1 = vld [vmem:[#allocation8_spill] sm:$0xff]  ;;  %v4011_v2 = vld [vmem:[#allocation9_spill] sm:$0xff] }
 0x1bb   : > { %1530 = vmatprep.subr.mxu0 %v1403_v42  ;;  %1637 = vmatprep.subr.mxu1 %v1405_v23  ;;  %v1386_v26 = vmax.f32 %v3310_v60, %v1282_v63  ;;  %v1388_v37 = vmax.f32 %v3312_v29, %v1284_v0  ;;  %v1259_v24 = vmul.f32 0.01, %v4006_v38  ;;  %v1261_v61 = vmul.f32 0.01, %v4007_v39  ;;  %v4012_v63 = vld [vmem:[#allocation6_spill] sm:$0xff]  ;;  %v4013_v0 = vld [vmem:[#allocation7_spill] sm:$0xff] }
 0x1bc   : > { %v3458_v40 = vpop.f32.mrf.mxu0  ;;  %v3460_v19 = vpop.f32.mrf.mxu1  ;;  %1531 = vmatpush1.msra.mxu0 %v1402_v14  ;;  %1638 = vmatpush1.msra.mxu1 %v1404_v16  ;;  %v1379_v56 = vmax.f32 %v3304_v27, %v1275_v35  ;;  %v1381_v6 = vmax.f32 %v3308_v49, %v1277_v36  ;;  %v1258_v60 = vmul.f32 0.01, %v4008_v46  ;;  %v1260_v29 = vmul.f32 0.01, %v4009_v25 }
 0x1bd   : > { %1532 = vmatprep.subr.mxu0 %v1395_v15  ;;  %1639 = vmatprep.subr.mxu1 %v1397_v17  ;;  %v1378_v5 = vmax.f32 %v3302_v54, %v1274_v52  ;;  %v1380_v30 = vmax.f32 %v3306_v28, %v1276_v18  ;;  %v1251_v27 = vmul.f32 0.01, %v4010_v1  ;;  %v1253_v49 = vmul.f32 0.01, %v4011_v2 }
 0x1be   : > { %v3470_v50 = vpop.f32.mrf.mxu0  ;;  %v3472_v31 = vpop.f32.mrf.mxu1  ;;  %1533 = vmatpush1.msra.mxu0 %v1394_v57  ;;  %1640 = vmatpush1.msra.mxu1 %v1396_v58  ;;  %v1371_v42 = vmax.f32 %v3298_v59, %v1267_v11  ;;  %v1373_v23 = vmax.f32 %v3300_v53, %v1269_v3  ;;  %v1250_v54 = vmul.f32 0.01, %v4012_v63  ;;  %v1252_v28 = vmul.f32 0.01, %v4013_v0 }
 0x1bf   : > { %1534 = vmatprep.subr.mxu0 %v1387_v8  ;;  %1641 = vmatprep.subr.mxu1 %v1389_v9  ;;  %v1370_v14 = vmax.f32 %v4004_v45, %v1266_v62  ;;  %v1372_v16 = vmax.f32 %v4005_v7, %v1268_v12  ;;  %v1363_v59 = vmax.f32 %v4006_v38, %v1259_v24  ;;  %v3517_v45 = vld [vmem:[%s3947_s4] sm:$0xff]  ;;  %v3536_v38 = vld [vmem:[%s3947_s4 + $0x8] sm:$0xff] }
 0x1c0   : > { %v3482_v34 = vpop.f32.mrf.mxu0  ;;  %v3484_v13 = vpop.f32.mrf.mxu1  ;;  %1535 = vmatpush1.msra.mxu0 %v1386_v26  ;;  %1642 = vmatpush1.msra.mxu1 %v1388_v37  ;;  %v1365_v53 = vmax.f32 %v4007_v39, %v1261_v61  ;;  %v1362_v15 = vmax.f32 %v4008_v46, %v1258_v60  ;;  %v1364_v17 = vmax.f32 %v4009_v25, %v1260_v29  ;;  %v4015_v37 = vmov 0.0  }
 0x1c1   : > { %1536 = vmatprep.subr.mxu0 %v1379_v56  ;;  %1643 = vmatprep.subr.mxu1 %v1381_v6  ;;  %v1355_v57 = vmax.f32 %v4010_v1, %v1251_v27  ;;  %v1357_v58 = vmax.f32 %v4011_v2, %v1253_v49  ;;  %v1354_v11 = vmax.f32 %v4012_v63, %v1250_v54  ;;  %v3555_v6 = vld [vmem:[%s3947_s4 + $0x10] sm:$0xff]  ;;  %v3593_v49 = vld [vmem:[%s3947_s4 + $0x20] sm:$0xff] }
 0x1c2   : > { %v3494_v35 = vpop.f32.mrf.mxu0  ;;  %v3496_v36 = vpop.f32.mrf.mxu1  ;;  %1537 = vmatpush1.msra.mxu0 %v1378_v5  ;;  %1644 = vmatpush1.msra.mxu1 %v1380_v30  ;;  %v1356_v3 = vmax.f32 %v4013_v0, %v1252_v28  ;;  %4014 = vst [vmem:[#allocation14_spill] sm:$0xff] %v3517_v45  ;;  %4016 = vst [vmem:[#allocation15_spill] sm:$0xff] %v3536_v38  ;;  %v3574_v5 = vld [vmem:[%s3947_s4 + $0x18] sm:$0xff]  ;;  %v3604_v0 = vld [vmem:[%s3947_s4 + $0x28] sm:$0xff] }
 0x1c3   : > { %1538 = vmatprep.subr.mxu0 %v1371_v42  ;;  %1645 = vmatprep.subr.mxu1 %v1373_v23  ;;  %4017 = vst [vmem:[#allocation12_spill] sm:$0xff] %v3555_v6  ;;  %4018 = vst [vmem:[#allocation13_spill] sm:$0xff] %v3574_v5 }
 0x1c4   : > { %v3502_v52 = vpop.f32.mrf.mxu0  ;;  %v3504_v18 = vpop.f32.mrf.mxu1  ;;  %1539 = vmatpush1.msra.mxu0 %v1370_v14  ;;  %1646 = vmatpush1.msra.mxu1 %v1372_v16  ;;  %4019 = vst [vmem:[#allocation10_spill] sm:$0xff] %v3593_v49  ;;  %4020 = vst [vmem:[#allocation11_spill] sm:$0xff] %v3604_v0  ;;  %v3613_v16 = vld [vmem:[%s3947_s4 + $0x30] sm:$0x7] }
 0x1c5   : > { %1540 = vmatprep.subr.mxu0 %v1363_v59  ;;  %1647 = vmatprep.subr.mxu1 %v1365_v53  ;;  %4021 = vst [vmem:[#allocation8_spill] sm:$0xff] %v3613_v16 }
 0x1c6   : > { %v3510_v8 = vpop.f32.mrf.mxu0  ;;  %v3512_v9 = vpop.f32.mrf.mxu1  ;;  %1541 = vmatpush1.msra.mxu0 %v1362_v15  ;;  %1648 = vmatpush1.msra.mxu1 %v1364_v17 }
 0x1c7   : > { %1542 = vmatprep.subr.mxu0 %v1355_v57  ;;  %1649 = vmatprep.subr.mxu1 %v1357_v58 }
 0x1c8   : > { %v3519_v62 = vpop.f32.mrf.mxu0  ;;  %v3521_v7 = vpop.f32.mrf.mxu1  ;;  %1543 = vmatpush1.msra.mxu0 %v1354_v11  ;;  %1650 = vmatpush1.msra.mxu1 %v1356_v3 }
 0x1c9   : > { %2562 = vmatmul.mubr.msk.f32.vlgmr.msra.gmra.mxu0 %vm1465_vm3, %v3517_v45  ;;  %2571 = vmatmul.mubr.msk.f32.vlgmr.msra.gmra.mxu1 %vm1465_vm3, %v3517_v45 }
 0x1ca   : > { %v3527_v12 = vpop.f32.mrf.mxu0  ;;  %v3529_v26 = vpop.f32.mrf.mxu1  ;;  %1582 = vmatprep.mubr.f32.mxu0 %v4015_v37  ;;  %1689 = vmatprep.mubr.f32.mxu1 %v4015_v37 }
 0x1cc   : > { %v3538_v24 = vpop.f32.mrf.mxu0  ;;  %v3540_v39 = vpop.f32.mrf.mxu1 }
 0x1cd   : > { %2563 = vmatmul.mubr.msk.f32.gmra.mxu0 %vm1465_vm3, %v3536_v38  ;;  %2572 = vmatmul.mubr.msk.f32.gmra.mxu1 %vm1465_vm3, %v3536_v38 }
 0x1ce   : > { %v3546_v61 = vpop.f32.mrf.mxu0  ;;  %v3548_v56 = vpop.f32.mrf.mxu1  ;;  %1588 = vmatprep.mubr.f32.mxu0 %v4015_v37  ;;  %1695 = vmatprep.mubr.f32.mxu1 %v4015_v37 }
 0x1d0   : > { %v3557_v46 = vpop.f32.mrf.mxu0  ;;  %v3559_v60 = vpop.f32.mrf.mxu1 }
 0x1d1   : > { %2564 = vmatmul.mubr.msk.f32.gmra.mxu0 %vm1465_vm3, %v3555_v6  ;;  %2573 = vmatmul.mubr.msk.f32.gmra.mxu1 %vm1465_vm3, %v3555_v6 }
 0x1d2   : > { %v3565_v25 = vpop.f32.mrf.mxu0  ;;  %v3567_v29 = vpop.f32.mrf.mxu1  ;;  %1594 = vmatprep.mubr.f32.mxu0 %v4015_v37  ;;  %1701 = vmatprep.mubr.f32.mxu1 %v4015_v37 }
 0x1d3   : > { %v1327_v44 = vmul.f32 0.01, %v3565_v25 }
 0x1d4   : > { %v3576_v30 = vpop.f32.mrf.mxu0  ;;  %v3578_v1 = vpop.f32.mrf.mxu1 }
 0x1d5   : > { %2565 = vmatmul.mubr.msk.f32.gmra.mxu0 %vm1465_vm3, %v3574_v5  ;;  %2574 = vmatmul.mubr.msk.f32.gmra.mxu1 %vm1465_vm3, %v3574_v5  ;;  %v1334_v47 = vmul.f32 0.01, %v3576_v30  ;;  %v1336_v48 = vmul.f32 0.01, %v3578_v1 }
 0x1d6   : > { %v3584_v27 = vpop.f32.mrf.mxu0  ;;  %v3586_v2 = vpop.f32.mrf.mxu1  ;;  %1600 = vmatprep.mubr.f32.mxu0 %v4015_v37  ;;  %1707 = vmatprep.mubr.f32.mxu1 %v4015_v37 }
 0x1d7   : > { %v1337_v6 = vmul.f32 0.01, %v3586_v2 }
 0x1d8   : > { %v1096_v42 = vpop.f32.mrf.mxu0  ;;  %v1239_v23 = vpop.f32.mrf.mxu1 }
 0x1d9   : > { %2566 = vmatmul.mubr.msk.f32.gmra.mxu0 %vm1465_vm3, %v3593_v49  ;;  %2575 = vmatmul.mubr.msk.f32.gmra.mxu1 %vm1465_vm3, %v3593_v49  ;;  %v1342_v49 = vmul.f32 0.01, %v1096_v42  ;;  %v1344_v5 = vmul.f32 0.01, %v1239_v23 }
 0x1da   : > { %v1098_v63 = vpop.f32.mrf.mxu0  ;;  %v1241_v54 = vpop.f32.mrf.mxu1  ;;  %1606 = vmatprep.mubr.f32.mxu0 %v4015_v37  ;;  %1713 = vmatprep.mubr.f32.mxu1 %v4015_v37 }
 0x1db   : > { %v1343_v59 = vmul.f32 0.01, %v1098_v63  ;;  %v1345_v58 = vmul.f32 0.01, %v1241_v54 }
 0x1dc   : > { %v1102_v28 = vpop.f32.mrf.mxu0  ;;  %v1245_v14 = vpop.f32.mrf.mxu1 }
 0x1dd   : > { %2567 = vmatmul.mubr.msk.f32.gmra.mxu0 %vm1465_vm3, %v3604_v0  ;;  %2576 = vmatmul.mubr.msk.f32.gmra.mxu1 %vm1465_vm3, %v3604_v0  ;;  %v1350_v53 = vmul.f32 0.01, %v1102_v28  ;;  %v1352_v15 = vmul.f32 0.01, %v1245_v14  ;;  %v1335_v0 = vmul.f32 0.01, %v3584_v27 }
 0x1de   : > { %v1104_v17 = vpop.f32.mrf.mxu0  ;;  %v1247_v57 = vpop.f32.mrf.mxu1  ;;  %1612 = vmatprep.mubr.f32.mxu0 %v4015_v37  ;;  %1719 = vmatprep.mubr.f32.mxu1 %v4015_v37 }
 0x1df   : > { %v1351_v11 = vmul.f32 0.01, %v1104_v17  ;;  %v1353_v3 = vmul.f32 0.01, %v1247_v57  ;;  %v1454_v22 = vmax.f32 %v1102_v28, %v1350_v53  ;;  %v1456_v21 = vmax.f32 %v1245_v14, %v1352_v15 }
 0x1e0   : > { %v1446_v28 = vmax.f32 %v1096_v42, %v1342_v49  ;;  %v1448_v14 = vmax.f32 %v1239_v23, %v1344_v5  ;;  %v1319_v53 = vmul.f32 0.01, %v3546_v61  ;;  %v1321_v15 = vmul.f32 0.01, %v3548_v56 }
 0x1e1   : > { %v1455_v38 = vmax.f32 %v1104_v17, %v1351_v11  ;;  %v1457_v45 = vmax.f32 %v1247_v57, %v1353_v3  ;;  %2568 = vmatmul.mubr.msk.f32.gmra.mxu0 %vm1465_vm3, %v3613_v16  ;;  %2577 = vmatmul.mubr.msk.f32.gmra.mxu1 %vm1465_vm3, %v3613_v16  ;;  %v1329_v17 = vmul.f32 0.01, %v3567_v29  ;;  %v1447_v57 = vmax.f32 %v1098_v63, %v1343_v59 }
 0x1e2   : > { %1790 = vmatprep.mubr.f32.mxu0 %v4015_v37  ;;  %1897 = vmatprep.mubr.f32.mxu1 %v4015_v37  ;;  %v1449_v11 = vmax.f32 %v1241_v54, %v1345_v58  ;;  %v1326_v3 = vmul.f32 0.01, %v3557_v46  ;;  %v1328_v16 = vmul.f32 0.01, %v3559_v60  ;;  %v1439_v63 = vmax.f32 %v3584_v27, %v1335_v0 }
 0x1e3   : > { %2578 = vmatprep.subr.msk.mxu0 %vm1487_vm2, %v1455_v38  ;;  %2587 = vmatprep.subr.msk.mxu1 %vm1487_vm2, %v1457_v45  ;;  %v1441_v38 = vmax.f32 %v3586_v2, %v1337_v6  ;;  %v1318_v45 = vmul.f32 0.01, %v3538_v24  ;;  %v1320_v54 = vmul.f32 0.01, %v3540_v39  ;;  %v1438_v5 = vmax.f32 %v3576_v30, %v1334_v47 }
 0x1e4   : > { %2579 = vmatpush1.msk.msra.mxu0 %vm1487_vm2, %v1454_v22  ;;  %2588 = vmatpush1.msk.msra.mxu1 %vm1487_vm2, %v1456_v21  ;;  %v1440_v22 = vmax.f32 %v3578_v1, %v1336_v48  ;;  %v1311_v21 = vmul.f32 0.01, %v3527_v12  ;;  %v1313_v49 = vmul.f32 0.01, %v3529_v26  ;;  %v1431_v27 = vmax.f32 %v3565_v25, %v1327_v44 }
 0x1e5   : > { %1734 = vmatprep.subr.mxu0 %v1447_v57  ;;  %1841 = vmatprep.subr.mxu1 %v1449_v11  ;;  %v1433_v6 = vmax.f32 %v3567_v29, %v1329_v17  ;;  %v1310_v2 = vmul.f32 0.01, %v3519_v62  ;;  %v1312_v42 = vmul.f32 0.01, %v3521_v7  ;;  %v1430_v47 = vmax.f32 %v3557_v46, %v1326_v3 }
 0x1e6   : > { %1735 = vmatpush1.msra.mxu0 %v1446_v28  ;;  %1842 = vmatpush1.msra.mxu1 %v1448_v14  ;;  %v1432_v48 = vmax.f32 %v3559_v60, %v1328_v16  ;;  %v1303_v30 = vmul.f32 0.01, %v3510_v8  ;;  %v1305_v1 = vmul.f32 0.01, %v3512_v9  ;;  %v1423_v44 = vmax.f32 %v3546_v61, %v1319_v53 }
 0x1e7   : > { %1736 = vmatprep.subr.mxu0 %v1439_v63  ;;  %1843 = vmatprep.subr.mxu1 %v1441_v38  ;;  %v1425_v25 = vmax.f32 %v3548_v56, %v1321_v15  ;;  %v1302_v29 = vmul.f32 0.01, %v3502_v52  ;;  %v1304_v23 = vmul.f32 0.01, %v3504_v18  ;;  %v1422_v46 = vmax.f32 %v3538_v24, %v1318_v45 }
 0x1e8   : > { %1737 = vmatpush1.msra.mxu0 %v1438_v5  ;;  %1844 = vmatpush1.msra.mxu1 %v1440_v22  ;;  %v1424_v60 = vmax.f32 %v3540_v39, %v1320_v54  ;;  %v1295_v0 = vmul.f32 0.01, %v3494_v35  ;;  %v1297_v16 = vmul.f32 0.01, %v3496_v36  ;;  %v1415_v61 = vmax.f32 %v3527_v12, %v1311_v21  ;;  %v4022_v22 = vld [vmem:[#allocation22_spill] sm:$0xff] }
 0x1e9   : > { %1738 = vmatprep.subr.mxu0 %v1431_v27  ;;  %1845 = vmatprep.subr.mxu1 %v1433_v6  ;;  %v1417_v56 = vmax.f32 %v3529_v26, %v1313_v49  ;;  %v1294_v59 = vmul.f32 0.01, %v3482_v34  ;;  %v1296_v58 = vmul.f32 0.01, %v3484_v13  ;;  %v1414_v24 = vmax.f32 %v3519_v62, %v1310_v2  ;;  %v4023_v49 = vld [vmem:[#allocation20_spill] sm:$0xff]  ;;  %v4024_v6 = vld [vmem:[#allocation21_spill] sm:$0xff] }
 0x1ea   : > { %1739 = vmatpush1.msra.mxu0 %v1430_v47  ;;  %1846 = vmatpush1.msra.mxu1 %v1432_v48  ;;  %v1416_v39 = vmax.f32 %v3521_v7, %v1312_v42  ;;  %v1287_v17 = vmul.f32 0.01, %v3470_v50  ;;  %v1289_v57 = vmul.f32 0.01, %v3472_v31  ;;  %v1407_v12 = vmax.f32 %v3510_v8, %v1303_v30  ;;  %v4025_v42 = vld [vmem:[#allocation18_spill] sm:$0xff]  ;;  %v4026_v48 = vld [vmem:[#allocation19_spill] sm:$0xff] }
 0x1eb   : > { %1740 = vmatprep.subr.mxu0 %v1423_v44  ;;  %1847 = vmatprep.subr.mxu1 %v1425_v25  ;;  %v1409_v26 = vmax.f32 %v3512_v9, %v1305_v1  ;;  %v1286_v11 = vmul.f32 0.01, %v3458_v40  ;;  %v1288_v3 = vmul.f32 0.01, %v3460_v19  ;;  %v1406_v62 = vmax.f32 %v3502_v52, %v1302_v29  ;;  %v4027_v1 = vld [vmem:[#allocation16_spill] sm:$0xff]  ;;  %v4028_v25 = vld [vmem:[#allocation17_spill] sm:$0xff] }
 0x1ec   : > { %1741 = vmatpush1.msra.mxu0 %v1422_v46  ;;  %1848 = vmatpush1.msra.mxu1 %v1424_v60  ;;  %v1408_v7 = vmax.f32 %v3504_v18, %v1304_v23  ;;  %v1279_v28 = vmul.f32 0.01, %v3446_v20  ;;  %v1281_v14 = vmul.f32 0.01, %v3448_v55  ;;  %v1399_v8 = vmax.f32 %v3494_v35, %v1295_v0  ;;  %v4029_v0 = vld [vmem:[#allocation14_spill] sm:$0xff] }
 0x1ed   : > { %1742 = vmatprep.subr.mxu0 %v1415_v61  ;;  %1849 = vmatprep.subr.mxu1 %v1417_v56  ;;  %v1401_v9 = vmax.f32 %v3496_v36, %v1297_v16  ;;  %v1278_v53 = vmul.f32 0.01, %v3434_v33  ;;  %v1280_v15 = vmul.f32 0.01, %v3436_v51  ;;  %v1398_v52 = vmax.f32 %v3482_v34, %v1294_v59  ;;  %v4030_v16 = vld [vmem:[#allocation15_spill] sm:$0xff]  ;;  %v4031_v61 = vld [vmem:[#allocation12_spill] sm:$0xff] }
 0x1ee   : > { %1743 = vmatpush1.msra.mxu0 %v1414_v24  ;;  %1850 = vmatpush1.msra.mxu1 %v1416_v39  ;;  %v1400_v18 = vmax.f32 %v3484_v13, %v1296_v58  ;;  %v1271_v63 = vmul.f32 0.01, %v3422_v41  ;;  %v1273_v38 = vmul.f32 0.01, %v3424_v43  ;;  %v1391_v35 = vmax.f32 %v3470_v50, %v1287_v17  ;;  %v4032_v56 = vld [vmem:[#allocation13_spill] sm:$0xff]  ;;  %v4033_v59 = vld [vmem:[#allocation10_spill] sm:$0xff] }
 0x1ef   : > { %1744 = vmatprep.subr.mxu0 %v1407_v12  ;;  %1851 = vmatprep.subr.mxu1 %v1409_v26  ;;  %v1393_v36 = vmax.f32 %v3472_v31, %v1289_v57  ;;  %v1270_v45 = vmul.f32 0.01, %v3410_v10  ;;  %v1272_v54 = vmul.f32 0.01, %v3412_v32  ;;  %v1390_v34 = vmax.f32 %v3458_v40, %v1286_v11  ;;  %v4034_v58 = vld [vmem:[#allocation11_spill] sm:$0xff]  ;;  %v4035_v24 = vld [vmem:[#allocation8_spill] sm:$0xff] }
 0x1f0   : > { %1745 = vmatpush1.msra.mxu0 %v1406_v62  ;;  %1852 = vmatpush1.msra.mxu1 %v1408_v7  ;;  %v1392_v13 = vmax.f32 %v3460_v19, %v1288_v3  ;;  %v1263_v5 = vmul.f32 0.01, %v3398_v4  ;;  %v1265_v21 = vmul.f32 0.01, %v4022_v22  ;;  %v1383_v50 = vmax.f32 %v3446_v20, %v1279_v28 }
 0x1f1   : > { %1746 = vmatprep.subr.mxu0 %v1399_v8  ;;  %1853 = vmatprep.subr.mxu1 %v1401_v9  ;;  %v1385_v31 = vmax.f32 %v3448_v55, %v1281_v14  ;;  %v1262_v27 = vmul.f32 0.01, %v4023_v49  ;;  %v1264_v2 = vmul.f32 0.01, %v4024_v6  ;;  %v1382_v40 = vmax.f32 %v3434_v33, %v1278_v53 }
 0x1f2   : > { %1747 = vmatpush1.msra.mxu0 %v1398_v52  ;;  %1854 = vmatpush1.msra.mxu1 %v1400_v18  ;;  %v1384_v19 = vmax.f32 %v3436_v51, %v1280_v15  ;;  %v1255_v47 = vmul.f32 0.01, %v4025_v42  ;;  %v1257_v30 = vmul.f32 0.01, %v4026_v48  ;;  %v1375_v20 = vmax.f32 %v3422_v41, %v1271_v63 }
 0x1f3   : > { %1748 = vmatprep.subr.mxu0 %v1391_v35  ;;  %1855 = vmatprep.subr.mxu1 %v1393_v36  ;;  %v1377_v55 = vmax.f32 %v3424_v43, %v1273_v38  ;;  %v1254_v44 = vmul.f32 0.01, %v4027_v1  ;;  %v1256_v29 = vmul.f32 0.01, %v4028_v25  ;;  %v1374_v33 = vmax.f32 %v3410_v10, %v1270_v45 }
 0x1f4   : > { %1749 = vmatpush1.msra.mxu0 %v1390_v34  ;;  %1856 = vmatpush1.msra.mxu1 %v1392_v13  ;;  %v1376_v51 = vmax.f32 %v3412_v32, %v1272_v54  ;;  %v1367_v23 = vmax.f32 %v3398_v4, %v1263_v5  ;;  %v1369_v46 = vmax.f32 %v4022_v22, %v1265_v21 }
 0x1f5   : > { %1750 = vmatprep.subr.mxu0 %v1383_v50  ;;  %1857 = vmatprep.subr.mxu1 %v1385_v31  ;;  %v1366_v41 = vmax.f32 %v4023_v49, %v1262_v27  ;;  %v1368_v43 = vmax.f32 %v4024_v6, %v1264_v2  ;;  %v1359_v60 = vmax.f32 %v4025_v42, %v1255_v47 }
 0x1f6   : > { %1751 = vmatpush1.msra.mxu0 %v1382_v40  ;;  %1858 = vmatpush1.msra.mxu1 %v1384_v19  ;;  %v1361_v10 = vmax.f32 %v4026_v48, %v1257_v30  ;;  %v1358_v32 = vmax.f32 %v4027_v1, %v1254_v44  ;;  %v1360_v4 = vmax.f32 %v4028_v25, %v1256_v29 }
 0x1f7   : > { %1752 = vmatprep.subr.mxu0 %v1375_v20  ;;  %1859 = vmatprep.subr.mxu1 %v1377_v55 }
 0x1f8   : > { %1753 = vmatpush1.msra.mxu0 %v1374_v33  ;;  %1860 = vmatpush1.msra.mxu1 %v1376_v51 }
 0x1f9   : > { %1754 = vmatprep.subr.mxu0 %v1367_v23  ;;  %1861 = vmatprep.subr.mxu1 %v1369_v46 }
 0x1fa   : > { %1755 = vmatpush1.msra.mxu0 %v1366_v41  ;;  %1862 = vmatpush1.msra.mxu1 %v1368_v43 }
 0x1fb   : > { %1756 = vmatprep.subr.mxu0 %v1359_v60  ;;  %1863 = vmatprep.subr.mxu1 %v1361_v10 }
 0x1fc   : > { %1757 = vmatpush1.msra.mxu0 %v1358_v32  ;;  %1864 = vmatpush1.msra.mxu1 %v1360_v4 }
 0x1fd   : > { %2580 = vmatmul.mubr.msk.f32.vlgmr.msra.gmra.mxu0 %vm1465_vm3, %v4029_v0  ;;  %2589 = vmatmul.mubr.msk.f32.vlgmr.msra.gmra.mxu1 %vm1465_vm3, %v4029_v0 }
 0x1fe   : > { %1796 = vmatprep.mubr.f32.mxu0 %v4015_v37  ;;  %1903 = vmatprep.mubr.f32.mxu1 %v4015_v37 }
 0x201   : > { %2581 = vmatmul.mubr.msk.f32.gmra.mxu0 %vm1465_vm3, %v4030_v16  ;;  %2590 = vmatmul.mubr.msk.f32.gmra.mxu1 %vm1465_vm3, %v4030_v16 }
 0x202   : > { %1802 = vmatprep.mubr.f32.mxu0 %v4015_v37  ;;  %1909 = vmatprep.mubr.f32.mxu1 %v4015_v37 }
 0x205   : > { %2582 = vmatmul.mubr.msk.f32.gmra.mxu0 %vm1465_vm3, %v4031_v61  ;;  %2591 = vmatmul.mubr.msk.f32.gmra.mxu1 %vm1465_vm3, %v4031_v61 }
 0x206   : > { %1808 = vmatprep.mubr.f32.mxu0 %v4015_v37  ;;  %1915 = vmatprep.mubr.f32.mxu1 %v4015_v37 }
 0x209   : > { %2583 = vmatmul.mubr.msk.f32.gmra.mxu0 %vm1465_vm3, %v4032_v56  ;;  %2592 = vmatmul.mubr.msk.f32.gmra.mxu1 %vm1465_vm3, %v4032_v56 }
 0x20a   : > { %1814 = vmatprep.mubr.f32.mxu0 %v4015_v37  ;;  %1921 = vmatprep.mubr.f32.mxu1 %v4015_v37 }
 0x20d   : > { %2584 = vmatmul.mubr.msk.f32.gmra.mxu0 %vm1465_vm3, %v4033_v59  ;;  %2593 = vmatmul.mubr.msk.f32.gmra.mxu1 %vm1465_vm3, %v4033_v59 }
 0x20e   : > { %1820 = vmatprep.mubr.f32.mxu0 %v4015_v37  ;;  %1927 = vmatprep.mubr.f32.mxu1 %v4015_v37 }
 0x211   : > { %2585 = vmatmul.mubr.msk.f32.gmra.mxu0 %vm1465_vm3, %v4034_v58  ;;  %2594 = vmatmul.mubr.msk.f32.gmra.mxu1 %vm1465_vm3, %v4034_v58 }
 0x212   : > { %1826 = vmatprep.mubr.f32.mxu0 %v4015_v37  ;;  %1933 = vmatprep.mubr.f32.mxu1 %v4015_v37 }
 0x215   : > { %2586 = vmatmul.mubr.msk.f32.gmra.mxu0 %vm1465_vm3, %v4035_v24  ;;  %2595 = vmatmul.mubr.msk.f32.gmra.mxu1 %vm1465_vm3, %v4035_v24 }
 0x216   : > { %2144 = vmatprep.mubr.f32.mxu0 %v4015_v37  ;;  %2215 = vmatprep.mubr.f32.mxu1 %v4015_v37 }
 0x289   : > { %v3757_v39 = vpop.f32.mrf.mxu0  ;;  %v3759_v17 = vpop.f32.mrf.mxu1 }
 0x28b   : > { %v3761_v57 = vpop.f32.mrf.mxu0  ;;  %v3763_v12 = vpop.f32.mrf.mxu1 }
 0x28d   : > { %v3765_v26 = vpop.f32.mrf.mxu0  ;;  %v3767_v11 = vpop.f32.mrf.mxu1 }
 0x28f   : > { %v3769_v3 = vpop.f32.mrf.mxu0  ;;  %v3771_v62 = vpop.f32.mrf.mxu1 }
 0x291   : > { %v3773_v7 = vpop.f32.mrf.mxu0  ;;  %v3775_v28 = vpop.f32.mrf.mxu1 }
 0x292   : > { %v1956_v59 = vmul.f32 0.01, %v3773_v7  ;;  %v1958_v58 = vmul.f32 0.01, %v3775_v28 }
 0x293   : > { %v3777_v14 = vpop.f32.mrf.mxu0  ;;  %v3779_v8 = vpop.f32.mrf.mxu1 }
 0x294   : > { %v1957_v0 = vmul.f32 0.01, %v3777_v14  ;;  %v1959_v16 = vmul.f32 0.01, %v3779_v8 }
 0x295   : > { %v3781_v9 = vpop.f32.mrf.mxu0  ;;  %v3783_v53 = vpop.f32.mrf.mxu1 }
 0x296   : > { %v1964_v23 = vmul.f32 0.01, %v3781_v9  ;;  %v1966_v46 = vmul.f32 0.01, %v3783_v53 }
 0x297   : > { %v3785_v15 = vpop.f32.mrf.mxu0  ;;  %v3787_v52 = vpop.f32.mrf.mxu1 }
 0x298   : > { %v1965_v13 = vmul.f32 0.01, %v3785_v15  ;;  %v1967_v5 = vmul.f32 0.01, %v3787_v52  ;;  %v2020_v24 = vmax.f32 %v3781_v9, %v1964_v23  ;;  %v1943_v9 = vmul.f32 0.01, %v3763_v12 }
 0x299   : > { %v1602_v18 = vpop.f32.mrf.mxu0  ;;  %v1709_v63 = vpop.f32.mrf.mxu1 }
 0x29a   : > { %v1972_v20 = vmul.f32 0.01, %v1602_v18  ;;  %v1974_v55 = vmul.f32 0.01, %v1709_v63  ;;  %v2021_v61 = vmax.f32 %v3785_v15, %v1965_v13  ;;  %v2023_v56 = vmax.f32 %v3787_v52, %v1967_v5 }
 0x29b   : > { %v1604_v38 = vpop.f32.mrf.mxu0  ;;  %v1711_v35 = vpop.f32.mrf.mxu1  ;;  %v1948_v15 = vmul.f32 0.01, %v3765_v26  ;;  %v1950_v52 = vmul.f32 0.01, %v3767_v11  ;;  %v2014_v13 = vmax.f32 %v3775_v28, %v1958_v58 }
 0x29c   : > { %v1973_v6 = vmul.f32 0.01, %v1604_v38  ;;  %v1975_v47 = vmul.f32 0.01, %v1711_v35  ;;  %v2028_v32 = vmax.f32 %v1602_v18, %v1972_v20  ;;  %v2030_v4 = vmax.f32 %v1709_v63, %v1974_v55 }
 0x29d   : > { %v1608_v36 = vpop.f32.mrf.mxu0  ;;  %v1715_v45 = vpop.f32.mrf.mxu1  ;;  %v2022_v18 = vmax.f32 %v3783_v53, %v1966_v46  ;;  %v1949_v63 = vmul.f32 0.01, %v3769_v3  ;;  %v2013_v53 = vmax.f32 %v3777_v14, %v1957_v0  ;;  %v2004_v14 = vmax.f32 %v3765_v26, %v1948_v15  ;;  %v3828_v26 = vld [vmem:[%s3948_s5] sm:$0x1] }
 0x29e   : > { %v1980_v2 = vmul.f32 0.01, %v1608_v36  ;;  %v1982_v40 = vmul.f32 0.01, %v1715_v45  ;;  %v2029_v60 = vmax.f32 %v1604_v38, %v1973_v6  ;;  %v2031_v10 = vmax.f32 %v1711_v35, %v1975_v47 }
 0x29f   : > { %v1610_v54 = vpop.f32.mrf.mxu0  ;;  %v1717_v34 = vpop.f32.mrf.mxu1  ;;  %v1951_v38 = vmul.f32 0.01, %v3771_v62  ;;  %v1941_v35 = vmul.f32 0.01, %v3761_v57  ;;  %v2005_v5 = vmax.f32 %v3769_v3, %v1949_v63 }
 0x2a0   : > { %v1981_v22 = vmul.f32 0.01, %v1610_v54  ;;  %v1983_v31 = vmul.f32 0.01, %v1717_v34  ;;  %v2036_v41 = vmax.f32 %v1608_v36, %v1980_v2  ;;  %v2038_v43 = vmax.f32 %v1715_v45, %v1982_v40 }
 0x2a1   : > { %v1614_v21 = vpop.f32.mrf.mxu0  ;;  %v1721_v50 = vpop.f32.mrf.mxu1  ;;  %v2015_v36 = vmax.f32 %v3779_v8, %v1959_v16  ;;  %v1940_v45 = vmul.f32 0.01, %v3757_v39  ;;  %v2006_v8 = vmax.f32 %v3767_v11, %v1950_v52 }
 0x2a2   : > { %v1988_v49 = vmul.f32 0.01, %v1614_v21  ;;  %v1990_v27 = vmul.f32 0.01, %v1721_v50  ;;  %v2037_v25 = vmax.f32 %v1610_v54, %v1981_v22  ;;  %v2039_v29 = vmax.f32 %v1717_v34, %v1983_v31 }
 0x2a3   : > { %v1616_v19 = vpop.f32.mrf.mxu0  ;;  %v1723_v42 = vpop.f32.mrf.mxu1  ;;  %v1942_v54 = vmul.f32 0.01, %v3759_v17  ;;  %v2012_v34 = vmax.f32 %v3773_v7, %v1956_v59  ;;  %v2007_v22 = vmax.f32 %v3771_v62, %v1951_v38  ;;  %v1999_v7 = vmax.f32 %v3763_v12, %v1943_v9 }
 0x2a4   : > { %v1989_v48 = vmul.f32 0.01, %v1616_v19  ;;  %v1991_v30 = vmul.f32 0.01, %v1723_v42  ;;  %v2044_v1 = vmax.f32 %v1614_v21, %v1988_v49  ;;  %v2046_v44 = vmax.f32 %v1721_v50, %v1990_v27 }
 0x2a5   : > { %v1997_v21 = vmax.f32 %v3761_v57, %v1941_v35  ;;  %v1996_v28 = vmax.f32 %v3757_v39, %v1940_v45  ;;  %v1998_v3 = vmax.f32 %v3759_v17, %v1942_v54 }
 0x2a6   : > { %v2045_v33 = vmax.f32 %v1616_v19, %v1989_v48  ;;  %v2047_v51 = vmax.f32 %v1723_v42, %v1991_v30 }
 0x2a8   : > { %2596 = vmatprep.subr.msk.mxu0 %vm653_vm0, %v2045_v33  ;;  %2599 = vmatprep.subr.msk.mxu1 %vm653_vm0, %v2047_v51 }
 0x2a9   : > { %2597 = vmatpush1.msk.msra.mxu0 %vm653_vm0, %v2044_v1  ;;  %2600 = vmatpush1.msk.msra.mxu1 %vm653_vm0, %v2046_v44 }
 0x2aa   : > { %2100 = vmatprep.subr.mxu0 %v2037_v25  ;;  %2171 = vmatprep.subr.mxu1 %v2039_v29 }
 0x2ab   : > { %2101 = vmatpush1.msra.mxu0 %v2036_v41  ;;  %2172 = vmatpush1.msra.mxu1 %v2038_v43 }
 0x2ac   : > { %2102 = vmatprep.subr.mxu0 %v2029_v60  ;;  %2173 = vmatprep.subr.mxu1 %v2031_v10 }
 0x2ad   : > { %2103 = vmatpush1.msra.mxu0 %v2028_v32  ;;  %2174 = vmatpush1.msra.mxu1 %v2030_v4 }
 0x2ae   : > { %2104 = vmatprep.subr.mxu0 %v2021_v61  ;;  %2175 = vmatprep.subr.mxu1 %v2023_v56 }
 0x2af   : > { %2105 = vmatpush1.msra.mxu0 %v2020_v24  ;;  %2176 = vmatpush1.msra.mxu1 %v2022_v18 }
 0x2b0   : > { %2106 = vmatprep.subr.mxu0 %v2013_v53  ;;  %2177 = vmatprep.subr.mxu1 %v2015_v36 }
 0x2b1   : > { %2107 = vmatpush1.msra.mxu0 %v2012_v34  ;;  %2178 = vmatpush1.msra.mxu1 %v2014_v13 }
 0x2b2   : > { %2108 = vmatprep.subr.mxu0 %v2005_v5  ;;  %2179 = vmatprep.subr.mxu1 %v2007_v22 }
 0x2b3   : > { %2109 = vmatpush1.msra.mxu0 %v2004_v14  ;;  %2180 = vmatpush1.msra.mxu1 %v2006_v8 }
 0x2b4   : > { %2110 = vmatprep.subr.mxu0 %v1997_v21  ;;  %2181 = vmatprep.subr.mxu1 %v1999_v7 }
 0x2b5   : > { %2111 = vmatpush1.msra.mxu0 %v1996_v28  ;;  %2182 = vmatpush1.msra.mxu1 %v1998_v3 }
 0x2b6   : > { %2598 = vmatmul.mubr.msk.f32.vlgmr.msra.gmra.mxu0 %vm613_vm1, %v3828_v26  ;;  %2601 = vmatmul.mubr.msk.f32.vlgmr.msra.gmra.mxu1 %vm613_vm1, %v3828_v26 }
 0x2b7   : > { %2286 = vmatprep.mubr.f32.mxu0 %v4015_v37  ;;  %2357 = vmatprep.mubr.f32.mxu1 %v4015_v37 }
 0x2bd   : > { %v3836_v39 = vpop.f32.mrf.mxu0  ;;  %v3838_v17 = vpop.f32.mrf.mxu1 }
 0x2bf   : > { %v3840_v57 = vpop.f32.mrf.mxu0  ;;  %v3842_v12 = vpop.f32.mrf.mxu1 }
 0x2c1   : > { %v3844_v11 = vpop.f32.mrf.mxu0  ;;  %v3846_v62 = vpop.f32.mrf.mxu1 }
 0x2c3   : > { %v3848_v50 = vpop.f32.mrf.mxu0  ;;  %v3850_v31 = vpop.f32.mrf.mxu1 }
 0x2c4   : > { %v1953_v7 = vmul.f32 0.01, %v3848_v50  ;;  %v1955_v28 = vmul.f32 0.01, %v3850_v31 }
 0x2c5   : > { %v3852_v49 = vpop.f32.mrf.mxu0  ;;  %v3854_v27 = vpop.f32.mrf.mxu1 }
 0x2c6   : > { %v1960_v22 = vmul.f32 0.01, %v3852_v49  ;;  %v1962_v14 = vmul.f32 0.01, %v3854_v27 }
 0x2c7   : > { %v3856_v37 = vpop.f32.mrf.mxu0  ;;  %v3858_v6 = vpop.f32.mrf.mxu1 }
 0x2c8   : > { %v1961_v54 = vmul.f32 0.01, %v3856_v37  ;;  %v1963_v34 = vmul.f32 0.01, %v3858_v6 }
 0x2c9   : > { %v3860_v2 = vpop.f32.mrf.mxu0  ;;  %v3862_v40 = vpop.f32.mrf.mxu1 }
 0x2ca   : > { %v1968_v9 = vmul.f32 0.01, %v3860_v2  ;;  %v1970_v53 = vmul.f32 0.01, %v3862_v40 }
 0x2cb   : > { %v3864_v19 = vpop.f32.mrf.mxu0  ;;  %v3866_v42 = vpop.f32.mrf.mxu1 }
 0x2cc   : > { %v1969_v38 = vmul.f32 0.01, %v3864_v19  ;;  %v1971_v15 = vmul.f32 0.01, %v3866_v42 }
 0x2cd   : > { %v1816_v47 = vpop.f32.mrf.mxu0  ;;  %v1923_v48 = vpop.f32.mrf.mxu1 }
 0x2ce   : > { %v1976_v58 = vmul.f32 0.01, %v1816_v47  ;;  %v1978_v24 = vmul.f32 0.01, %v1923_v48  ;;  %v2025_v3 = vmax.f32 %v3864_v19, %v1969_v38  ;;  %v2017_v19 = vmax.f32 %v3856_v37, %v1961_v54 }
 0x2cf   : > { %v1818_v30 = vpop.f32.mrf.mxu0  ;;  %v1925_v20 = vpop.f32.mrf.mxu1 }
 0x2d0   : > { %v1977_v16 = vmul.f32 0.01, %v1818_v30  ;;  %v1979_v61 = vmul.f32 0.01, %v1925_v20  ;;  %v2032_v8 = vmax.f32 %v1816_v47, %v1976_v58  ;;  %v2034_v21 = vmax.f32 %v1923_v48, %v1978_v24 }
 0x2d1   : > { %v1822_v55 = vpop.f32.mrf.mxu0  ;;  %v1929_v1 = vpop.f32.mrf.mxu1  ;;  %v2026_v47 = vmax.f32 %v3862_v40, %v1970_v53  ;;  %v1945_v48 = vmul.f32 0.01, %v3840_v57  ;;  %v2018_v40 = vmax.f32 %v3854_v27, %v1962_v14 }
 0x2d2   : > { %v1984_v4 = vmul.f32 0.01, %v1822_v55  ;;  %v1986_v0 = vmul.f32 0.01, %v1929_v1  ;;  %v2033_v13 = vmax.f32 %v1818_v30, %v1977_v16  ;;  %v2035_v5 = vmax.f32 %v1925_v20, %v1979_v61 }
 0x2d3   : > { %v1824_v44 = vpop.f32.mrf.mxu0  ;;  %v1931_v25 = vpop.f32.mrf.mxu1  ;;  %v1952_v30 = vmul.f32 0.01, %v3844_v11  ;;  %v1954_v20 = vmul.f32 0.01, %v3846_v62 }
 0x2d4   : > { %v1985_v51 = vmul.f32 0.01, %v1824_v44  ;;  %v1987_v60 = vmul.f32 0.01, %v1931_v25  ;;  %v2040_v36 = vmax.f32 %v1822_v55, %v1984_v4  ;;  %v2042_v45 = vmax.f32 %v1929_v1, %v1986_v0 }
 0x2d5   : > { %v1828_v29 = vpop.f32.mrf.mxu0  ;;  %v1935_v33 = vpop.f32.mrf.mxu1  ;;  %v2027_v55 = vmax.f32 %v3866_v42, %v1971_v15  ;;  %v2024_v1 = vmax.f32 %v3860_v2, %v1968_v9  ;;  %v2019_v42 = vmax.f32 %v3858_v6, %v1963_v34  ;;  %v2016_v2 = vmax.f32 %v3852_v49, %v1960_v22 }
 0x2d6   : > { %v1992_v23 = vmul.f32 0.01, %v1828_v29  ;;  %v1994_v46 = vmul.f32 0.01, %v1935_v33  ;;  %v2041_v52 = vmax.f32 %v1824_v44, %v1985_v51  ;;  %v2043_v35 = vmax.f32 %v1931_v25, %v1987_v60 }
 0x2d7   : > { %v1830_v41 = vpop.f32.mrf.mxu0  ;;  %v1937_v43 = vpop.f32.mrf.mxu1  ;;  %v1947_v44 = vmul.f32 0.01, %v3842_v12  ;;  %v1944_v25 = vmul.f32 0.01, %v3836_v39  ;;  %v2011_v51 = vmax.f32 %v3850_v31, %v1955_v28  ;;  %v2008_v37 = vmax.f32 %v3844_v11, %v1952_v30 }
 0x2d8   : > { %v1993_v10 = vmul.f32 0.01, %v1830_v41  ;;  %v1995_v32 = vmul.f32 0.01, %v1937_v43  ;;  %v2048_v18 = vmax.f32 %v1828_v29, %v1992_v23  ;;  %v2050_v63 = vmax.f32 %v1935_v33, %v1994_v46 }
 0x2d9   : > { %v1946_v29 = vmul.f32 0.01, %v3838_v17  ;;  %v2009_v33 = vmax.f32 %v3848_v50, %v1953_v7  ;;  %v2010_v6 = vmax.f32 %v3846_v62, %v1954_v20  ;;  %v2001_v23 = vmax.f32 %v3840_v57, %v1945_v48 }
 0x2da   : > { %v2049_v56 = vmax.f32 %v1830_v41, %v1993_v10  ;;  %v2051_v59 = vmax.f32 %v1937_v43, %v1995_v32  ;;  %v2003_v49 = vmax.f32 %v3842_v12, %v1947_v44  ;;  %v2000_v27 = vmax.f32 %v3836_v39, %v1944_v25  ;;  %v4036_v41 = vld [vmem:[#allocation5_spill] sm:$0xff] }
 0x2db   : > { %v2002_v50 = vmax.f32 %v3838_v17, %v1946_v29  ;;  %v2722_v57 = vmov 1966171168  }
 0x2dc   : > { %2602 = vmatprep.subr.msk.mxu0 %vm653_vm0, %v2049_v56  ;;  %2605 = vmatprep.subr.msk.mxu1 %vm653_vm0, %v2051_v59  ;;  %v2377_v12 = vunpack.c.l.s4 %v2722_v57 }
 0x2dd   : > { %2603 = vmatpush1.msk.msra.mxu0 %vm653_vm0, %v2048_v18  ;;  %2606 = vmatpush1.msk.msra.mxu1 %vm653_vm0, %v2050_v63 }
 0x2de   : > { %2242 = vmatprep.subr.mxu0 %v2041_v52  ;;  %2313 = vmatprep.subr.mxu1 %v2043_v35  ;;  %v2378_v39 = vunpack.c.0.s8 %v2377_v12 }
 0x2df   : > { %2243 = vmatpush1.msra.mxu0 %v2040_v36  ;;  %2314 = vmatpush1.msra.mxu1 %v2042_v45 }
 0x2e0   : > { %2244 = vmatprep.subr.mxu0 %v2033_v13  ;;  %2315 = vmatprep.subr.mxu1 %v2035_v5  ;;  %v2381_v43 = vsub.s32 %v2378_v39, %v4036_v41 }
 0x2e1   : > { %2245 = vmatpush1.msra.mxu0 %v2032_v8  ;;  %2316 = vmatpush1.msra.mxu1 %v2034_v21 }
 0x2e2   : > { %2246 = vmatprep.subr.mxu0 %v2025_v3  ;;  %2317 = vmatprep.subr.mxu1 %v2027_v55 }
 0x2e3   : > { %2247 = vmatpush1.msra.mxu0 %v2024_v1  ;;  %2318 = vmatpush1.msra.mxu1 %v2026_v47 }
 0x2e4   : > { %2248 = vmatprep.subr.mxu0 %v2017_v19  ;;  %2319 = vmatprep.subr.mxu1 %v2019_v42 }
 0x2e5   : > { %2249 = vmatpush1.msra.mxu0 %v2016_v2  ;;  %2320 = vmatpush1.msra.mxu1 %v2018_v40 }
 0x2e6   : > { %2250 = vmatprep.subr.mxu0 %v2009_v33  ;;  %2321 = vmatprep.subr.mxu1 %v2011_v51 }
 0x2e7   : > { %2251 = vmatpush1.msra.mxu0 %v2008_v37  ;;  %2322 = vmatpush1.msra.mxu1 %v2010_v6 }
 0x2e8   : > { %2252 = vmatprep.subr.mxu0 %v2001_v23  ;;  %2323 = vmatprep.subr.mxu1 %v2003_v49 }
 0x2e9   : > { %2253 = vmatpush1.msra.mxu0 %v2000_v27  ;;  %2324 = vmatpush1.msra.mxu1 %v2002_v50 }
 0x2ea   : > { %2604 = vmatmul.mubr.msk.f32.vlgmr.msra.gmra.mxu0 %vm613_vm1, %v3828_v26  ;;  %2607 = vmatmul.mubr.msk.f32.vlgmr.msra.gmra.mxu1 %vm613_vm1, %v3828_v26 }
 0x376   : > { %v2146_v11 = vpop.f32.mrf.mxu0  ;;  %v2217_v62 = vpop.f32.mrf.mxu1 }
 0x378   : > { %v2148_v31 = vpop.f32.mrf.mxu0  ;;  %v2219_v17 = vpop.f32.mrf.mxu1 }
 0x379   : > { %v2372_v46 = vcombine.low %v2146_v11, %v2148_v31  ;;  %v2373_v60 = vcombine.low %v2217_v62, %v2219_v17 }
 0x37b   : > { %v2382_v4 = vrot.slane %v2372_v46, %v2381_v43  ;;  %v2389_v0 = vrot.slane %v2373_v60, %v2381_v43 }
 0x37d   : > { %v2404_v59 = vcombine.low %v2382_v4, %v2389_v0 }
 0x37f   : > { %v2412_v63 = vrot.slane %v2404_v59, %v2381_v43 }
 0x3aa   : > { %v2288_v10 = vpop.f32.mrf.mxu0  ;;  %v2359_v32 = vpop.f32.mrf.mxu1 }
 0x3ac   : > { %v2290_v16 = vpop.f32.mrf.mxu0  ;;  %v2361_v61 = vpop.f32.mrf.mxu1 }
 0x3ad   : > { %v2374_v26 = vcombine.low %v2288_v10, %v2290_v16  ;;  %v2375_v56 = vcombine.low %v2359_v32, %v2361_v61 }
 0x3af   : > { %v2396_v58 = vrot.slane %v2374_v26, %v2381_v43  ;;  %v2403_v24 = vrot.slane %v2375_v56, %v2381_v43 }
 0x3b1   : > { %v2405_v18 = vcombine.low %v2396_v58, %v2403_v24 }
 0x3b3   : > { %v2419_v38 = vrot.slane %v2405_v18, %v2381_v43 }
 0x3b5   : > { %v2420_v15 = vcombine.low %v2412_v63, %v2419_v38 }
 0x3b7   : > { %2422 = vst [vmem:[%s243_s11] sm:$0xff] %v2420_v15 }
 0x3b8   : > { %2671 = shalt.err (!%p2668_p3)
}
 0x3b9   : > { %s2672_s20 = scalar_lea.hbm %s2436_s15, 128  ;;  %s2676_s29 = scalar_lea.hbm %s3949_s6, 256 }
 0x3ba   : > { %p2673_p4 = scmp.ne.s32.totalorder %s2436_s15, %s2672_s20  ;;  %p2677_p9 = scmp.lt.s32.totalorder %s2436_s15, %s3949_s6 }
 0x3bb   : > { %p2678_p10 = scmp.lt.s32.totalorder %s2676_s29, %s2672_s20 }
 0x3bc   : > { %p2674_p7 = pnand %p2673_p4, %p2797_p5 }
 0x3bd   : > { %p2679_p11 = por %p2678_p10, %p2677_p9 }
 0x3be   : > { %p2675_p8 = pneg %p2674_p7 }
 0x3c0   : > { %p2680_p12 = pnand %p2679_p11, %p2675_p8 }
 0x3c2   : > { %2683 = shalt.err (!%p2680_p12)
}
 0x3c3   : > { %2614 = dma.vmem_to_hbm [thread:$0]  (%p2797_p5), %s2439_s12, 128, %s2436_s15, %s2424_s16  }
 0x3c4 PF: > { %p2620_p13 = scmp.ge.s32.totalorder %s2718_s24, 2  ;;  %s2450_s11 = sand.u32 1, %s2706_s21  }
 0x3c5   : > { %s2451_s13 = scalar_lea.sflag [#allocation3], %s2450_s11 }
 0x3c6   : > { %p2617_p0 = pnand %p2620_p13, %p2801_p6 }
 0x3c8   : > { %p2618_p1 = pneg %p2617_p0 }
 0x3ca   : > { %2701 = dma.done.wait (%p2618_p1), %s2451_s13, 128  }
 0x3cb   : > { %2703 = vsyncadd (%p2618_p1), %s2451_s13, 4294967168  ;;  %p16_p2 = scmp.ge.s32.totalorder %s2784_s27, 4   ;;  %s4037_s21 = smov %s2710_s22 }
 0x3cc   : > { %s4038_s22 = smov %s2714_s23  ;;  %s4039_s23 = smov %s2795_s30 }
 0x3cd   : > { %s4040_s24 = smov %s2784_s27  ;;  %18 = sbr.rel (!%p16_p2) target bundleno = 3 (0x3), region = 79 }
 0x3d2   :  { %2456 = vsyncpa [#allocation3], 1 }
 0x3d3   :  { %2458 = vsyncpa [#allocation3 + $0x1], 1 }

</bundles_post_ra>
